<compile_context>
chip_gen: v7x
topology: tpu7x:2x2x1
jax: 0.10.0
libtpu: 0.0.40
codegen_flags: <defaults>
</compile_context>

<pallas_src>
import functools

import jax
import jax.numpy as jnp
from jax.experimental import pallas as pl
from jax.experimental.pallas import tpu as pltpu


_LANE = 128
_SMALL_BYTES = 128 * 1024        # below this, plain XLA beats a pallas_call
_DEFAULT_BLOCK_BYTES = 1 << 20   # v5e-safe: 3 bufs x 2-deep = 6 MiB scoped VMEM
_BIG_BLOCK_BYTES = 4 << 20       # v6e/v7x: 3 bufs x 2-deep = 24 MiB
_BIG_VMEM_LIMIT = 40 << 20       # headroom above 24 MiB, < v7x's 64 MiB physical
_MEGACORE_MIN_BYTES = 1 << 20    # above this, keep >= 2 grid steps for v7x


def _skip_connect_kernel(x_first_ref, x_last_ref, o_ref, *, alpha):
    # Elementwise weighted initial connection on the VPU (HBM-bandwidth bound).
    # Same operation order as the PyTorch reference.
    o_ref[...] = ((1.0 - alpha) * x_last_ref[...]
                  + alpha * x_first_ref[...]).astype(o_ref.dtype)


def _jnp_blend(x_first, x_last, alpha):
    return (1.0 - alpha) * x_last + alpha * x_first


def _chip_tuning():
    """Pick (block_bytes, vmem_limit_bytes) per TPU generation."""
    try:
        kind = jax.devices()[0].device_kind.lower()
    except Exception:  # pragma: no cover - defensive
        kind = ""
    if ("v6" in kind) or ("v7" in kind):
        return _BIG_BLOCK_BYTES, _BIG_VMEM_LIMIT
    # v5e / unknown: 1 MiB blocks fit the 16 MiB default scoped VMEM and are
    # already at the ~0.8 TB/s roofline.
    return _DEFAULT_BLOCK_BYTES, None


def _round_up(x, m):
    return ((x + m - 1) // m) * m


def _lane_dense_cols(total):
    """Largest C (multiple of 128) that divides `total`, or None."""
    for c in (2048, 1024, 512, 256, 128):
        if total % c == 0:
            return c
    return None


def _blend(x_first, x_last, alpha):
    out_dtype = jnp.result_type(x_first.dtype, x_last.dtype)
    orig_shape = x_last.shape
    total = x_last.size
    itemsize = jnp.dtype(out_dtype).itemsize
    total_bytes = total * itemsize

    # Tiny graphs: pallas_call launch / pipeline overhead dominates and the
    # fused XLA elementwise op can fuse with neighbouring model ops.
    if total_bytes <= _SMALL_BYTES:
        return _jnp_blend(x_first, x_last, alpha).astype(out_dtype)

    block_bytes, vmem_limit = _chip_tuning()
    sub = max(8, 32 // itemsize)  # sublane packing: 8 f32 / 16 bf16 / 32 int8

    c = _lane_dense_cols(total)
    if c is not None:
        # Lane-dense 2-D slab: unmasked vld/vst, contiguous DMAs.
        rows = total // c
    elif x_last.ndim >= 2 and orig_shape[-1] * sub * itemsize <= block_bytes:
        # Ragged element count: keep the trailing dim at full extent and tile
        # only rows.  No pad / slice-back -> no extra HBM traffic.
        c = orig_shape[-1]
        rows = total // c
    else:
        # Rank-1 ragged (or pathologically wide trailing dim): plain XLA.
        return _jnp_blend(x_first, x_last, alpha).astype(out_dtype)

    xf = x_first.reshape(rows, c)
    xl = x_last.reshape(rows, c)

    target_rows = max(sub, block_bytes // (c * itemsize))
    if target_rows >= rows:
        if rows >= 2 * sub and total_bytes > _MEGACORE_MIN_BYTES:
            # Keep >= 2 grid steps so v7x megacore can split the work.
            bn = _round_up(pl.cdiv(rows, 2), sub)
        else:
            bn = rows  # single full-extent block (always a legal block shape)
    else:
        bn = max(sub, (target_rows // sub) * sub)

    grid = (pl.cdiv(rows, bn),)
    spec = pl.BlockSpec((bn, c), lambda i: (i, 0))
    kernel = functools.partial(_skip_connect_kernel, alpha=float(alpha))

    cp_kwargs = dict(dimension_semantics=("parallel",))
    if vmem_limit is not None:
        cp_kwargs["vmem_limit_bytes"] = int(vmem_limit)

    out = pl.pallas_call(
        kernel,
        out_shape=jax.ShapeDtypeStruct((rows, c), out_dtype),
        grid=grid,
        in_specs=[spec, spec],
        out_specs=spec,
        compiler_params=pltpu.CompilerParams(**cp_kwargs),
    )(xf, xl)

    return out.reshape(orig_shape)


def initial_connection(Xs, alpha=0.5):
    """JAX/Pallas equivalent of InitialConnection.forward(Xs)."""
    assert len(Xs) >= 1
    if len(Xs) == 1:
        # Identity path: return as-is (no HBM round-trip through a copy kernel).
        return Xs[-1]
    return _blend(Xs[0], Xs[-1], alpha)


if __name__ == "__main__":
    key = jax.random.PRNGKey(0)
    keys = jax.random.split(key, 10)

    alpha = 0.5

    # 1) Lane-dense Pallas path (f32, element count a multiple of 128).
    N, D = 1024, 512
    X0 = jax.random.normal(keys[0], (N, D), dtype=jnp.float32)
    X1 = jax.random.normal(keys[1], (N, D), dtype=jnp.float32)
    X2 = jax.random.normal(keys[2], (N, D), dtype=jnp.float32)
    out = jax.block_until_ready(initial_connection([X0, X1, X2], alpha=alpha))
    ref = (1.0 - alpha) * X2 + alpha * X0
    assert out.shape == ref.shape and out.dtype == ref.dtype
    assert jnp.allclose(out, ref, atol=1e-6, rtol=1e-6)

    # 2) bf16 path: exercises sublane-aware (16-row) blocking.
    B0 = jax.random.normal(keys[3], (512, 384), dtype=jnp.bfloat16)
    B1 = jax.random.normal(keys[4], (512, 384), dtype=jnp.bfloat16)
    out_b = jax.block_until_ready(initial_connection([B0, B1], alpha=alpha))
    ref_b = ((1.0 - alpha) * B1.astype(jnp.float32)
             + alpha * B0.astype(jnp.float32)).astype(jnp.bfloat16)
    assert out_b.shape == ref_b.shape and out_b.dtype == jnp.bfloat16
    assert jnp.allclose(out_b.astype(jnp.float32), ref_b.astype(jnp.float32),
                        atol=3e-2, rtol=3e-2)

    # 3) Ragged large path (element count not a multiple of 128): trailing dim
    #    at full extent, row tiling with a masked partial edge block, no pad.
    alpha2 = 0.3
    R0 = jax.random.normal(keys[5], (2000, 385), dtype=jnp.float32)
    R1 = jax.random.normal(keys[6], (2000, 385), dtype=jnp.float32)
    out_r = jax.block_until_ready(initial_connection([R0, R1], alpha=alpha2))
    ref_r = (1.0 - alpha2) * R1 + alpha2 * R0
    assert out_r.shape == ref_r.shape and out_r.dtype == ref_r.dtype
    assert jnp.allclose(out_r, ref_r, atol=1e-6, rtol=1e-6)

    # 4) Tiny-input fast path (fused XLA, no pallas_call).
    Y0 = jax.random.normal(keys[7], (7, 45), dtype=jnp.float32)
    Y1 = jax.random.normal(keys[8], (7, 45), dtype=jnp.float32)
    out_t = jax.block_until_ready(initial_connection([Y0, Y1], alpha=alpha2))
    ref_t = (1.0 - alpha2) * Y1 + alpha2 * Y0
    assert out_t.shape == ref_t.shape and out_t.dtype == ref_t.dtype
    assert jnp.allclose(out_t, ref_t, atol=1e-6, rtol=1e-6)

    # 5) Single-element list path: identity (returned directly, no kernel).
    out_1 = jax.block_until_ready(initial_connection([X0], alpha=alpha))
    assert jnp.allclose(out_1, X0, atol=0.0, rtol=0.0)

    print("KERNEL_OK")
</pallas_src>

<mosaic_0001>
module attributes {stable_mosaic.version = 11 : i64} {
  func.func @_skip_connect_kernel(%arg0: i32, %arg1: memref<128x2048xf32, #tpu.memory_space<vmem>>, %arg2: memref<128x2048xf32, #tpu.memory_space<vmem>>, %arg3: memref<128x2048xf32, #tpu.memory_space<vmem>>) attributes {dimension_semantics = [#tpu.dimension_semantics<parallel>], iteration_bounds = array<i64: 2>, scalar_prefetch = 0 : i64, scratch_operands = 0 : i64, tpu.core_type = #tpu.core_type<tc>, window_params = [{transform_indices = @transform_0, window_bounds = array<i64: 128, 2048>}, {transform_indices = @transform_1, window_bounds = array<i64: 128, 2048>}, {transform_indices = @transform_2, window_bounds = array<i64: 128, 2048>}]} {
    %c0 = arith.constant 0 : index
    %c0_0 = arith.constant 0 : index
    %0 = vector.load %arg2[%c0, %c0_0] : memref<128x2048xf32, #tpu.memory_space<vmem>>, vector<128x2048xf32>
    %cst = arith.constant 5.000000e-01 : f32
    %1 = vector.broadcast %cst : f32 to vector<128x2048xf32>
    %2 = arith.mulf %1, %0 : vector<128x2048xf32>
    %c0_1 = arith.constant 0 : index
    %c0_2 = arith.constant 0 : index
    %3 = vector.load %arg1[%c0_1, %c0_2] : memref<128x2048xf32, #tpu.memory_space<vmem>>, vector<128x2048xf32>
    %cst_3 = arith.constant 5.000000e-01 : f32
    %4 = vector.broadcast %cst_3 : f32 to vector<128x2048xf32>
    %5 = arith.mulf %4, %3 : vector<128x2048xf32>
    %6 = arith.addf %2, %5 : vector<128x2048xf32>
    %c0_4 = arith.constant 0 : index
    %c0_5 = arith.constant 0 : index
    %7 = vector.load %arg3[%c0_4, %c0_5] : memref<128x2048xf32, #tpu.memory_space<vmem>>, vector<128x2048xf32>
    tpu.vector_store %arg3[%c0_4, %c0_5], %6 {strides = array<i32>} : memref<128x2048xf32, #tpu.memory_space<vmem>>, vector<128x2048xf32>,
    return
  }
  func.func @transform_0(%arg0: i32) -> (i32, i32) {
    %c0_i32 = arith.constant 0 : i32
    %c0_i32_0 = arith.constant 0 : i32
    return %arg0, %c0_i32 : i32, i32
  }
  func.func @transform_1(%arg0: i32) -> (i32, i32) {
    %c0_i32 = arith.constant 0 : i32
    %c0_i32_0 = arith.constant 0 : i32
    return %arg0, %c0_i32 : i32, i32
  }
  func.func @transform_2(%arg0: i32) -> (i32, i32) {
    %c0_i32 = arith.constant 0 : i32
    %c0_i32_0 = arith.constant 0 : i32
    return %arg0, %c0_i32 : i32, i32
  }
}

</mosaic_0001>

<bundles_post_ra>
// kernel: tpu_custom_call.1
= control target key start
LH: loop header
LB: loop body
LE: loop exit
PB: predicated region body
PF: predicated region fallthrough
CT: control target
= control target key end

     0   :  { %7 = vsyncpa [#allocation3], 0  ;;  %s3093_s0 = inlined_call_operand.hbm [shape: f32[256,2048], index: 0, kind: input, shape index: {}]   ;;  %s3094_s1 = inlined_call_operand.hbm [shape: f32[256,2048], index: 1, kind: input, shape index: {}]   ;;  %s3095_s2 = inlined_call_operand.hbm [shape: f32[256,2048], index: 2, kind: output, shape index: {}]  }
   0x1   :  { %9 = vsyncpa [#allocation3 + $0x1], 0 }
   0x2   :  { %10 = vsyncpa [#allocation6], 0 }
   0x3   :  { %12 = vsyncpa [#allocation6 + $0x1], 0 }
   0x4   :  { %13 = vsyncpa [#allocation4], 0 }
   0x5   :  { %15 = vsyncpa [#allocation4 + $0x1], 0  ;;  %s2090_s9 = smov 0   ;;  %s2092_s10 = smov 0  }
   0x6   :  { %s2094_s11 = smov 0   ;;  %s2096_s12 = smov 0  }
   0x7 LB: > { %s2111_s13 = sadd.s32 4294967295, %s2066_s12   ;;  %s1854_s14 = sadd.s32 4294967294, %s2066_s12   ;;  %s2066_s12 = sphi %s2096_s12, %s3111_s12   ;;  %s2062_s11 = sphi %s2094_s11, %s3110_s11   ;;  %s2058_s10 = sphi %s2092_s10, %s3109_s10   ;;  %s2054_s9 = sphi %s2090_s9, %s3108_s9  }
   0x8   : > { %s2115_s15 = sadd.s32 1, %s2066_s12   ;;  %s28_s16 = sadd.s32 1, %s2062_s11 }
   0x9   : > { %s25_s17 = ssub.s32 %s2066_s12, %s2115_s15  ;;  %p35_p0 = scmp.ne.s32.totalorder %s2062_s11, %s2058_s10 }
   0xa   : > { %p26_p1 = scmp.eq.s32.totalorder %s25_s17, 0  ;;  %p36_p2 = scmp.eq.s32.totalorder %s2066_s12, 0 }
   0xb   : > { %p41_p3 = scmp.ne.s32.totalorder %s2058_s10, %s2054_s9  ;;  %p42_p4 = scmp.eq.s32.totalorder %s2111_s13, 0 }
   0xc   : > { %s2127_s18 = scalar_select %p26_p1, %s2062_s11, %s28_s16  }
   0xd   : > { %p2129_p5 = por %p36_p2, %p35_p0  ;;  %p2133_p6 = por %p42_p4, %p41_p3 }
   0xe   : > { %p91_p7 = scmp.eq.s32.totalorder %s2111_s13, 1  ;;  %p97_p8 = scmp.eq.s32.totalorder %s1854_s14, 1 }
   0xf   : > { %s3099_s20 = scalar_select %p2133_p6, 1, 0 }
  0x10   : > { %p1898_p10 = scmp.lt.s32.totalorder %s2066_s12, 2  ;;  %p2140_p11 = por %p91_p7, %p35_p0 }
  0x11   : > { %p2144_p12 = por %p97_p8, %p41_p3  ;;  %s2149_s23 = sand.u32 1, %s2062_s11  }
  0x12   : > { %s3100_s21 = scalar_select %p2140_p11, 1, 0 }
  0x13   : > { %s3101_s22 = scalar_select %p2144_p12, 1, 0 }
  0x14   : > { %s1876_s24 = sshll.u32 %s2066_s12, 15  ;;  %s1857_s25 = sshll.u32 %s2149_s23, 11 }
  0x15   : > { %s2158_s28 = scalar_lea.hbm %s3093_s0, %s1876_s24  ;;  %s121_s29 = scalar_lea.vmem [#allocation2], %s1857_s25 }
  0x16   : > { %s129_s30 = sshll.u32 %s121_s29, 4  ;;  %p2164_p13 = pnand %p1898_p10, %p2129_p5  ;;  %s2168_s30 = int_to_ptr.vmem [resolvable:$true] %s129_s30 }
  0x17   : > { %s118_s4 = scalar_lea.sflag [#allocation3], %s2149_s23  ;;  %s1936_s5 = scalar_lea.hbm %s2158_s28, 32768 }
  0x18   : > { %p1937_p0 = scmp.ne.s32.totalorder %s2158_s28, %s1936_s5  ;;  %p1938_p1 = pneg %p2164_p13 }
  0x19   : > { %s1941_s8 = scalar_lea.hbm %s3093_s0, 65536  ;;  %p1942_p4 = scmp.lt.u32.totalorder %s2158_s28, %s3093_s0 }
  0x1a   : > { %p1939_p2 = pnand %p1938_p1, %p1937_p0  ;;  %p1943_p5 = scmp.lt.u32.totalorder %s1941_s8, %s1936_s5 }
  0x1b   : > { %p1945_p8 = scmp.lt.u32.totalorder %s1936_s5, %s2158_s28 }
  0x1c   : > { %p1940_p3 = pneg %p1939_p2  ;;  %p1944_p7 = por %p1943_p5, %p1942_p4 }
  0x1e   : > { %p1946_p10 = por %p1945_p8, %p1944_p7 }
  0x20   : > { %p1947_p9 = pnand %p1946_p10, %p1940_p3 }
  0x22   : > { %1950 = shalt.err (!%p1947_p9)
}
  0x23   : > { %s1951_s17 = scalar_lea.vmem %s2168_s30, 32768  ;;  %s2068_s19 = smov [#allocation2]  }
  0x24   : > { %p1952_p0 = scmp.ne.s32.totalorder %s2168_s30, %s1951_s17  ;;  %s1956_s26 = sshll.u32 %s2068_s19, 4  ;;  %s1957_s26 = int_to_ptr.vmem [resolvable:$false] %s1956_s26 }
  0x25   : > { %s1958_s27 = scalar_lea.vmem %s1957_s26, 65536  ;;  %p1959_p11 = scmp.lt.s32.totalorder %s2168_s30, %s1957_s26 }
  0x26   : > { %p1954_p2 = pnand %p1952_p0, %p1938_p1  ;;  %p1960_p4 = scmp.lt.s32.totalorder %s1958_s27, %s1951_s17 }
  0x28   : > { %p1955_p12 = pneg %p1954_p2  ;;  %p1961_p5 = por %p1960_p4, %p1959_p11 }
  0x2a   : > { %p1962_p7 = pnand %p1961_p5, %p1955_p12 }
  0x2c   : > { %1965 = shalt.err (!%p1962_p7)
}
  0x2d   : > { %s2069_s29 = smov 2048   ;;  %s2070_s5 = smov 128  }
  0x2e   : > { %1890 = dma.hbm_to_vmem [thread:$0]  (!%p2164_p13), %s2158_s28, 32768, %s2168_s30, %s118_s4, %s2069_s29, %s2069_s29, %s2070_s5  }
  0x2f   : > { %p1865_p9 = scmp.ge.s32.totalorder %s2066_s12, 1  ;;  %p159_p11 = scmp.lt.s32.totalorder %s2066_s12, 3 }
  0x30   : > { %s2212_s14 = scalar_lea.hbm %s3094_s1, %s1876_s24  ;;  %s143_s16 = scalar_lea.vmem [#allocation5], %s1857_s25 }
  0x31   : > { %p2203_p12 = pnand %p1865_p9, %p159_p11  ;;  %s151_s17 = sshll.u32 %s143_s16, 4  ;;  %s2216_s17 = int_to_ptr.vmem [resolvable:$true] %s151_s17 }
  0x32   : > { %s140_s28 = scalar_lea.sflag [#allocation6], %s2149_s23  ;;  %s1966_s30 = scalar_lea.hbm %s2212_s14, 32768 }
  0x33   : > { %p1967_p3 = scmp.ne.s32.totalorder %s2212_s14, %s1966_s30  ;;  %s1971_s24 = scalar_lea.hbm %s3094_s1, 65536 }
  0x34   : > { %p1972_p0 = scmp.lt.u32.totalorder %s2212_s14, %s3094_s1  ;;  %p1973_p2 = scmp.lt.u32.totalorder %s1971_s24, %s1966_s30 }
  0x35   : > { %p1969_p8 = pnand %p1967_p3, %p1938_p1  ;;  %p1975_p5 = scmp.lt.u32.totalorder %s1966_s30, %s2212_s14 }
  0x36   : > { %p1974_p4 = por %p1973_p2, %p1972_p0 }
  0x37   : > { %p1970_p10 = pneg %p1969_p8 }
  0x38   : > { %p1976_p7 = por %p1975_p5, %p1974_p4 }
  0x3a   : > { %p1977_p9 = pnand %p1976_p7, %p1970_p10 }
  0x3c   : > { %1980 = shalt.err (!%p1977_p9)
}
  0x3d   : > { %s1981_s25 = scalar_lea.vmem %s2216_s17, 32768  ;;  %s2071_s7 = smov [#allocation5]  }
  0x3e   : > { %p1982_p11 = scmp.ne.s32.totalorder %s2216_s17, %s1981_s25  ;;  %s1986_s8 = sshll.u32 %s2071_s7, 4  ;;  %s1987_s8 = int_to_ptr.vmem [resolvable:$false] %s1986_s8 }
  0x3f   : > { %s1988_s16 = scalar_lea.vmem %s1987_s8, 65536  ;;  %p1989_p6 = scmp.lt.s32.totalorder %s2216_s17, %s1987_s8 }
  0x40   : > { %p1984_p3 = pnand %p1982_p11, %p1938_p1  ;;  %p1990_p0 = scmp.lt.s32.totalorder %s1988_s16, %s1981_s25 }
  0x42   : > { %p1985_p8 = pneg %p1984_p3  ;;  %p1991_p2 = por %p1990_p0, %p1989_p6 }
  0x44   : > { %p1992_p4 = pnand %p1991_p2, %p1985_p8 }
  0x46   : > { %1995 = shalt.err (!%p1992_p4)
}
  0x47   : > { %1893 = dma.hbm_to_vmem [thread:$0]  (!%p2164_p13), %s2212_s14, 32768, %s2216_s17, %s140_s28, %s2069_s29, %s2069_s29, %s2070_s5  }
  0x48   : > { %163 = sbr.rel (%p2203_p12) target bundleno = 317 (0x13d), region = 28  ;;  %s2250_s30 = sand.u32 (!%p2203_p12), 1, %s2058_s10  }
  0x49   : > { %s2253_s4 = sshll.u32 (!%p2203_p12), %s2250_s30, 11  ;;  %s166_s3 = scalar_lea.sflag (!%p2203_p12), [#allocation3], %s2250_s30 }
  0x4a   : > { %s2257_s19 = scalar_lea.vmem (!%p2203_p12), [#allocation2], %s2253_s4  ;;  %p3104_p6 = scmp.ne.s32.totalorder (!%p2203_p12), %s3099_s20, 0 }
  0x4f   : > { %2041 = dma.done.wait (%p3104_p6), %s166_s3, 32768  }
  0x50   : > { %2043 = vsyncadd (%p3104_p6), %s166_s3, 4294934528  ;;  %s175_s23 = scalar_lea.sflag [#allocation6], %s2250_s30  ;;  %s2265_s29 = scalar_lea.vmem [#allocation5], %s2253_s4 }
  0x51   : > { %2045 = dma.done.wait (%p3104_p6), %s175_s23, 32768  }
  0x52   : > { %2047 = vsyncadd (%p3104_p6), %s175_s23, 4294934528  ;;  %v207_v0 = vld [vmem:[%s2265_s29] sm:$0xff]  ;;  %v208_v2 = vld [vmem:[%s2265_s29 + $0x8] sm:$0xff]  ;;  %s2287_s20 = scalar_lea.vmem [#allocation7], %s2253_s4  ;;  %s1880_s5 = sshll.u32 %s2111_s13, 15 }
  0x53   : > { %v719_v1 = vld [vmem:[%s2257_s19] sm:$0xff]  ;;  %v463_v3 = vmul.f32 0.5, %v207_v0  ;;  %v464_v5 = vmul.f32 0.5, %v208_v2  ;;  %v720_v6 = vld [vmem:[%s2257_s19 + $0x8] sm:$0xff]  ;;  %v209_v7 = vld [vmem:[%s2265_s29 + $0x10] sm:$0xff]  ;;  %s1758_s6 = sshll.u32 %s2287_s20, 4  ;;  %s3042_s17 = scalar_lea.hbm %s3095_s2, %s1880_s5  ;;  %s3045_s6 = int_to_ptr.vmem [resolvable:$true] %s1758_s6 }
  0x54   : > { %v975_v4 = vmul.f32 0.5, %v719_v1  ;;  %v721_v8 = vld [vmem:[%s2257_s19 + $0x10] sm:$0xff]  ;;  %v976_v9 = vmul.f32 0.5, %v720_v6  ;;  %v465_v10 = vmul.f32 0.5, %v209_v7  ;;  %v210_v12 = vld [vmem:[%s2265_s29 + $0x18] sm:$0xff]  ;;  %v211_v14 = vld [vmem:[%s2265_s29 + $0x20] sm:$0xff] }
  0x55   : > { %v977_v11 = vmul.f32 0.5, %v721_v8  ;;  %v722_v13 = vld [vmem:[%s2257_s19 + $0x18] sm:$0xff]  ;;  %v466_v16 = vmul.f32 0.5, %v210_v12  ;;  %v467_v18 = vmul.f32 0.5, %v211_v14  ;;  %v723_v19 = vld [vmem:[%s2257_s19 + $0x20] sm:$0xff]  ;;  %v212_v20 = vld [vmem:[%s2265_s29 + $0x28] sm:$0xff] }
  0x56   : > { %v1231_v15 = vadd.f32 %v975_v4, %v463_v3  ;;  %v978_v17 = vmul.f32 0.5, %v722_v13  ;;  %v724_v21 = vld [vmem:[%s2257_s19 + $0x28] sm:$0xff]  ;;  %v1232_v22 = vadd.f32 %v976_v9, %v464_v5  ;;  %v979_v24 = vmul.f32 0.5, %v723_v19  ;;  %v213_v26 = vld [vmem:[%s2265_s29 + $0x30] sm:$0xff]  ;;  %v214_v28 = vld [vmem:[%s2265_s29 + $0x38] sm:$0xff]  ;;  %s1744_s28 = scalar_lea.sflag [#allocation4], %s2250_s30 }
  0x57   : > { %v1233_v23 = vadd.f32 %v977_v11, %v465_v10  ;;  %v468_v25 = vmul.f32 0.5, %v212_v20  ;;  %v725_v27 = vld [vmem:[%s2257_s19 + $0x30] sm:$0xff]  ;;  %v980_v30 = vmul.f32 0.5, %v724_v21  ;;  %v469_v31 = vmul.f32 0.5, %v213_v26  ;;  %v726_v33 = vld [vmem:[%s2257_s19 + $0x38] sm:$0xff]  ;;  %v215_v34 = vld [vmem:[%s2265_s29 + $0x40] sm:$0xff] }
  0x58   : > { %1487 = vst [vmem:[%s2287_s20] sm:$0xff] %v1231_v15  ;;  %v1234_v29 = vadd.f32 %v978_v17, %v466_v16  ;;  %v981_v32 = vmul.f32 0.5, %v725_v27  ;;  %v727_v35 = vld [vmem:[%s2257_s19 + $0x40] sm:$0xff]  ;;  %1488 = vst [vmem:[%s2287_s20 + $0x8] sm:$0xff] %v1232_v22  ;;  %v1235_v36 = vadd.f32 %v979_v24, %v467_v18  ;;  %v470_v37 = vmul.f32 0.5, %v214_v28  ;;  %v216_v40 = vld [vmem:[%s2265_s29 + $0x48] sm:$0xff]  ;;  %s1996_s24 = scalar_lea.vmem %s3045_s6, 32768 }
  0x59   : > { %1489 = vst [vmem:[%s2287_s20 + $0x10] sm:$0xff] %v1233_v23  ;;  %v982_v38 = vmul.f32 0.5, %v726_v33  ;;  %v471_v39 = vmul.f32 0.5, %v215_v34  ;;  %v728_v41 = vld [vmem:[%s2257_s19 + $0x48] sm:$0xff]  ;;  %v217_v42 = vld [vmem:[%s2265_s29 + $0x50] sm:$0xff]  ;;  %v1236_v43 = vadd.f32 %v980_v30, %v468_v25  ;;  %v983_v45 = vmul.f32 0.5, %v727_v35  ;;  %p1997_p13 = scmp.ne.s32.totalorder %s3045_s6, %s1996_s24 }
  0x5a   : > { %1490 = vst [vmem:[%s2287_s20 + $0x18] sm:$0xff] %v1234_v29  ;;  %v1237_v44 = vadd.f32 %v981_v32, %v469_v31  ;;  %v472_v46 = vmul.f32 0.5, %v216_v40  ;;  %v729_v47 = vld [vmem:[%s2257_s19 + $0x50] sm:$0xff]  ;;  %v218_v48 = vld [vmem:[%s2265_s29 + $0x58] sm:$0xff]  ;;  %1491 = vst [vmem:[%s2287_s20 + $0x20] sm:$0xff] %v1235_v36  ;;  %v984_v51 = vmul.f32 0.5, %v728_v41 }
  0x5b   : > { %v730_v49 = vld [vmem:[%s2257_s19 + $0x58] sm:$0xff]  ;;  %v1238_v50 = vadd.f32 %v982_v38, %v470_v37  ;;  %v473_v52 = vmul.f32 0.5, %v217_v42  ;;  %v985_v53 = vmul.f32 0.5, %v729_v47  ;;  %v219_v54 = vld [vmem:[%s2265_s29 + $0x60] sm:$0xff]  ;;  %v220_v56 = vld [vmem:[%s2265_s29 + $0x68] sm:$0xff]  ;;  %1492 = vst [vmem:[%s2287_s20 + $0x28] sm:$0xff] %v1236_v43  ;;  %v1239_v57 = vadd.f32 %v983_v45, %v471_v39 }
  0x5c   : > { %v731_v55 = vld [vmem:[%s2257_s19 + $0x60] sm:$0xff]  ;;  %1493 = vst [vmem:[%s2287_s20 + $0x30] sm:$0xff] %v1237_v44  ;;  %v474_v58 = vmul.f32 0.5, %v218_v48  ;;  %v986_v59 = vmul.f32 0.5, %v730_v49  ;;  %v475_v60 = vmul.f32 0.5, %v219_v54  ;;  %v732_v61 = vld [vmem:[%s2257_s19 + $0x68] sm:$0xff]  ;;  %v1240_v0 = vadd.f32 %v984_v51, %v472_v46 }
  0x5d   : > { %v221_v62 = vld [vmem:[%s2265_s29 + $0x70] sm:$0xff]  ;;  %1494 = vst [vmem:[%s2287_s20 + $0x38] sm:$0xff] %v1238_v50  ;;  %v1241_v1 = vadd.f32 %v985_v53, %v473_v52  ;;  %v987_v2 = vmul.f32 0.5, %v731_v55  ;;  %v476_v3 = vmul.f32 0.5, %v220_v56  ;;  %v222_v4 = vld [vmem:[%s2265_s29 + $0x78] sm:$0xff]  ;;  %v223_v6 = vld [vmem:[%s2265_s29 + $0x80] sm:$0xff] }
  0x5e   : > { %v733_v63 = vld [vmem:[%s2257_s19 + $0x70] sm:$0xff]  ;;  %v734_v5 = vld [vmem:[%s2257_s19 + $0x78] sm:$0xff]  ;;  %1495 = vst [vmem:[%s2287_s20 + $0x40] sm:$0xff] %v1239_v57  ;;  %v1242_v7 = vadd.f32 %v986_v59, %v474_v58  ;;  %v988_v8 = vmul.f32 0.5, %v732_v61  ;;  %v477_v9 = vmul.f32 0.5, %v221_v62  ;;  %v735_v11 = vld [vmem:[%s2257_s19 + $0x80] sm:$0xff] }
  0x5f   : > { %v989_v10 = vmul.f32 0.5, %v733_v63  ;;  %v224_v12 = vld [vmem:[%s2265_s29 + $0x88] sm:$0xff]  ;;  %1496 = vst [vmem:[%s2287_s20 + $0x48] sm:$0xff] %v1240_v0  ;;  %1497 = vst [vmem:[%s2287_s20 + $0x50] sm:$0xff] %v1241_v1  ;;  %v1243_v14 = vadd.f32 %v987_v2, %v475_v60  ;;  %v478_v15 = vmul.f32 0.5, %v222_v4  ;;  %v990_v16 = vmul.f32 0.5, %v734_v5 }
  0x60   : > { %v736_v13 = vld [vmem:[%s2257_s19 + $0x88] sm:$0xff]  ;;  %v479_v17 = vmul.f32 0.5, %v223_v6  ;;  %v225_v18 = vld [vmem:[%s2265_s29 + $0x90] sm:$0xff]  ;;  %v226_v20 = vld [vmem:[%s2265_s29 + $0x98] sm:$0xff]  ;;  %1498 = vst [vmem:[%s2287_s20 + $0x58] sm:$0xff] %v1242_v7  ;;  %v1244_v21 = vadd.f32 %v988_v8, %v476_v3  ;;  %v991_v23 = vmul.f32 0.5, %v735_v11 }
  0x61   : > { %v737_v19 = vld [vmem:[%s2257_s19 + $0x90] sm:$0xff]  ;;  %v1245_v22 = vadd.f32 %v989_v10, %v477_v9  ;;  %v480_v24 = vmul.f32 0.5, %v224_v12  ;;  %v738_v25 = vld [vmem:[%s2257_s19 + $0x98] sm:$0xff]  ;;  %v227_v26 = vld [vmem:[%s2265_s29 + $0xa0] sm:$0xff]  ;;  %1499 = vst [vmem:[%s2287_s20 + $0x60] sm:$0xff] %v1243_v14  ;;  %v1246_v28 = vadd.f32 %v990_v16, %v478_v15  ;;  %v992_v29 = vmul.f32 0.5, %v736_v13 }
  0x62   : > { %v739_v27 = vld [vmem:[%s2257_s19 + $0xa0] sm:$0xff]  ;;  %v481_v30 = vmul.f32 0.5, %v225_v18  ;;  %v993_v31 = vmul.f32 0.5, %v737_v19  ;;  %v228_v32 = vld [vmem:[%s2265_s29 + $0xa8] sm:$0xff]  ;;  %v229_v34 = vld [vmem:[%s2265_s29 + $0xb0] sm:$0xff]  ;;  %1500 = vst [vmem:[%s2287_s20 + $0x68] sm:$0xff] %v1244_v21  ;;  %v1247_v35 = vadd.f32 %v991_v23, %v479_v17 }
  0x63   : > { %v740_v33 = vld [vmem:[%s2257_s19 + $0xa8] sm:$0xff]  ;;  %1501 = vst [vmem:[%s2287_s20 + $0x70] sm:$0xff] %v1245_v22  ;;  %v482_v36 = vmul.f32 0.5, %v226_v20  ;;  %v994_v37 = vmul.f32 0.5, %v738_v25  ;;  %v483_v38 = vmul.f32 0.5, %v227_v26  ;;  %v741_v39 = vld [vmem:[%s2257_s19 + $0xb0] sm:$0xff]  ;;  %v1248_v42 = vadd.f32 %v992_v29, %v480_v24 }
  0x64   : > { %v230_v40 = vld [vmem:[%s2265_s29 + $0xb8] sm:$0xff]  ;;  %1502 = vst [vmem:[%s2287_s20 + $0x78] sm:$0xff] %v1246_v28  ;;  %v1249_v43 = vadd.f32 %v993_v31, %v481_v30  ;;  %v995_v44 = vmul.f32 0.5, %v739_v27  ;;  %v484_v45 = vmul.f32 0.5, %v228_v32  ;;  %v231_v46 = vld [vmem:[%s2265_s29 + $0xc0] sm:$0xff]  ;;  %v232_v48 = vld [vmem:[%s2265_s29 + $0xc8] sm:$0xff] }
  0x65   : > { %v742_v41 = vld [vmem:[%s2257_s19 + $0xb8] sm:$0xff]  ;;  %v743_v47 = vld [vmem:[%s2257_s19 + $0xc0] sm:$0xff]  ;;  %1503 = vst [vmem:[%s2287_s20 + $0x80] sm:$0xff] %v1247_v35  ;;  %v1250_v49 = vadd.f32 %v994_v37, %v482_v36  ;;  %v996_v50 = vmul.f32 0.5, %v740_v33  ;;  %v485_v51 = vmul.f32 0.5, %v229_v34  ;;  %v997_v52 = vmul.f32 0.5, %v741_v39 }
  0x66   : > { %v744_v53 = vld [vmem:[%s2257_s19 + $0xc8] sm:$0xff]  ;;  %v233_v54 = vld [vmem:[%s2265_s29 + $0xd0] sm:$0xff]  ;;  %1504 = vst [vmem:[%s2287_s20 + $0x88] sm:$0xff] %v1248_v42  ;;  %1505 = vst [vmem:[%s2287_s20 + $0x90] sm:$0xff] %v1249_v43  ;;  %v1251_v56 = vadd.f32 %v995_v44, %v483_v38  ;;  %v486_v57 = vmul.f32 0.5, %v230_v40  ;;  %v998_v58 = vmul.f32 0.5, %v742_v41 }
  0x67   : > { %v745_v55 = vld [vmem:[%s2257_s19 + $0xd0] sm:$0xff]  ;;  %v487_v59 = vmul.f32 0.5, %v231_v46  ;;  %v234_v60 = vld [vmem:[%s2265_s29 + $0xd8] sm:$0xff]  ;;  %v235_v62 = vld [vmem:[%s2265_s29 + $0xe0] sm:$0xff]  ;;  %1506 = vst [vmem:[%s2287_s20 + $0x98] sm:$0xff] %v1250_v49  ;;  %v1252_v63 = vadd.f32 %v996_v50, %v484_v45  ;;  %v1253_v0 = vadd.f32 %v997_v52, %v485_v51  ;;  %v999_v1 = vmul.f32 0.5, %v743_v47 }
  0x68   : > { %v746_v61 = vld [vmem:[%s2257_s19 + $0xd8] sm:$0xff]  ;;  %v488_v2 = vmul.f32 0.5, %v232_v48  ;;  %v747_v3 = vld [vmem:[%s2257_s19 + $0xe0] sm:$0xff]  ;;  %v236_v4 = vld [vmem:[%s2265_s29 + $0xe8] sm:$0xff]  ;;  %1507 = vst [vmem:[%s2287_s20 + $0xa0] sm:$0xff] %v1251_v56  ;;  %v1254_v5 = vadd.f32 %v998_v58, %v486_v57  ;;  %v1000_v6 = vmul.f32 0.5, %v744_v53 }
  0x69   : > { %v489_v7 = vmul.f32 0.5, %v233_v54  ;;  %v1001_v8 = vmul.f32 0.5, %v745_v55  ;;  %v748_v9 = vld [vmem:[%s2257_s19 + $0xe8] sm:$0xff]  ;;  %v237_v10 = vld [vmem:[%s2265_s29 + $0xf0] sm:$0xff]  ;;  %1508 = vst [vmem:[%s2287_s20 + $0xa8] sm:$0xff] %v1252_v63  ;;  %1509 = vst [vmem:[%s2287_s20 + $0xb0] sm:$0xff] %v1253_v0  ;;  %v1255_v12 = vadd.f32 %v999_v1, %v487_v59 }
  0x6a   : > { %v749_v11 = vld [vmem:[%s2257_s19 + $0xf0] sm:$0xff]  ;;  %v490_v13 = vmul.f32 0.5, %v234_v60  ;;  %v1002_v14 = vmul.f32 0.5, %v746_v61  ;;  %v491_v15 = vmul.f32 0.5, %v235_v62  ;;  %v238_v16 = vld [vmem:[%s2265_s29 + $0xf8] sm:$0xff]  ;;  %v239_v18 = vld [vmem:[%s2265_s29 + $0x100] sm:$0xff]  ;;  %v1256_v19 = vadd.f32 %v1000_v6, %v488_v2 }
  0x6b   : > { %v750_v17 = vld [vmem:[%s2257_s19 + $0xf8] sm:$0xff]  ;;  %1510 = vst [vmem:[%s2287_s20 + $0xb8] sm:$0xff] %v1254_v5  ;;  %v1257_v20 = vadd.f32 %v1001_v8, %v489_v7  ;;  %v1003_v21 = vmul.f32 0.5, %v747_v3  ;;  %v492_v22 = vmul.f32 0.5, %v236_v4  ;;  %v751_v23 = vld [vmem:[%s2257_s19 + $0x100] sm:$0xff]  ;;  %v240_v24 = vld [vmem:[%s2265_s29 + $0x108] sm:$0xff] }
  0x6c   : > { %1511 = vst [vmem:[%s2287_s20 + $0xc0] sm:$0xff] %v1255_v12  ;;  %v1258_v25 = vadd.f32 %v1002_v14, %v490_v13  ;;  %v1004_v26 = vmul.f32 0.5, %v748_v9  ;;  %v493_v27 = vmul.f32 0.5, %v237_v10  ;;  %v1005_v28 = vmul.f32 0.5, %v749_v11  ;;  %v752_v29 = vld [vmem:[%s2257_s19 + $0x108] sm:$0xff]  ;;  %v241_v30 = vld [vmem:[%s2265_s29 + $0x110] sm:$0xff] }
  0x6d   : > { %v753_v31 = vld [vmem:[%s2257_s19 + $0x110] sm:$0xff]  ;;  %1512 = vst [vmem:[%s2287_s20 + $0xc8] sm:$0xff] %v1256_v19  ;;  %1513 = vst [vmem:[%s2287_s20 + $0xd0] sm:$0xff] %v1257_v20  ;;  %v1259_v32 = vadd.f32 %v1003_v21, %v491_v15  ;;  %v494_v33 = vmul.f32 0.5, %v238_v16  ;;  %v1006_v34 = vmul.f32 0.5, %v750_v17  ;;  %v495_v35 = vmul.f32 0.5, %v239_v18 }
  0x6e   : > { %v242_v36 = vld [vmem:[%s2265_s29 + $0x118] sm:$0xff]  ;;  %v243_v38 = vld [vmem:[%s2265_s29 + $0x120] sm:$0xff]  ;;  %1514 = vst [vmem:[%s2287_s20 + $0xd8] sm:$0xff] %v1258_v25  ;;  %v1260_v39 = vadd.f32 %v1004_v26, %v492_v22  ;;  %v1261_v40 = vadd.f32 %v1005_v28, %v493_v27  ;;  %v1007_v41 = vmul.f32 0.5, %v751_v23  ;;  %v496_v42 = vmul.f32 0.5, %v240_v24  ;;  %v244_v44 = vld [vmem:[%s2265_s29 + $0x128] sm:$0xff] }
  0x6f   : > { %v754_v37 = vld [vmem:[%s2257_s19 + $0x118] sm:$0xff]  ;;  %v755_v43 = vld [vmem:[%s2257_s19 + $0x120] sm:$0xff]  ;;  %1515 = vst [vmem:[%s2287_s20 + $0xe0] sm:$0xff] %v1259_v32  ;;  %v1262_v45 = vadd.f32 %v1006_v34, %v494_v33  ;;  %v1008_v46 = vmul.f32 0.5, %v752_v29  ;;  %v497_v47 = vmul.f32 0.5, %v241_v30  ;;  %v1009_v48 = vmul.f32 0.5, %v753_v31 }
  0x70   : > { %v756_v49 = vld [vmem:[%s2257_s19 + $0x128] sm:$0xff]  ;;  %v245_v50 = vld [vmem:[%s2265_s29 + $0x130] sm:$0xff]  ;;  %1516 = vst [vmem:[%s2287_s20 + $0xe8] sm:$0xff] %v1260_v39  ;;  %1517 = vst [vmem:[%s2287_s20 + $0xf0] sm:$0xff] %v1261_v40  ;;  %v1263_v52 = vadd.f32 %v1007_v41, %v495_v35  ;;  %v498_v53 = vmul.f32 0.5, %v242_v36  ;;  %v1010_v54 = vmul.f32 0.5, %v754_v37 }
  0x71   : > { %v757_v51 = vld [vmem:[%s2257_s19 + $0x130] sm:$0xff]  ;;  %v499_v55 = vmul.f32 0.5, %v243_v38  ;;  %v246_v56 = vld [vmem:[%s2265_s29 + $0x138] sm:$0xff]  ;;  %v247_v58 = vld [vmem:[%s2265_s29 + $0x140] sm:$0xff]  ;;  %1518 = vst [vmem:[%s2287_s20 + $0xf8] sm:$0xff] %v1262_v45  ;;  %v1264_v59 = vadd.f32 %v1008_v46, %v496_v42  ;;  %v1265_v60 = vadd.f32 %v1009_v48, %v497_v47  ;;  %v1011_v61 = vmul.f32 0.5, %v755_v43 }
  0x72   : > { %v758_v57 = vld [vmem:[%s2257_s19 + $0x138] sm:$0xff]  ;;  %v500_v62 = vmul.f32 0.5, %v244_v44  ;;  %v759_v63 = vld [vmem:[%s2257_s19 + $0x140] sm:$0xff]  ;;  %v248_v0 = vld [vmem:[%s2265_s29 + $0x148] sm:$0xff]  ;;  %1519 = vst [vmem:[%s2287_s20 + $0x100] sm:$0xff] %v1263_v52  ;;  %v1266_v1 = vadd.f32 %v1010_v54, %v498_v53  ;;  %v1012_v2 = vmul.f32 0.5, %v756_v49 }
  0x73   : > { %v501_v3 = vmul.f32 0.5, %v245_v50  ;;  %v1013_v4 = vmul.f32 0.5, %v757_v51  ;;  %v760_v5 = vld [vmem:[%s2257_s19 + $0x148] sm:$0xff]  ;;  %v249_v6 = vld [vmem:[%s2265_s29 + $0x150] sm:$0xff]  ;;  %1520 = vst [vmem:[%s2287_s20 + $0x108] sm:$0xff] %v1264_v59  ;;  %1521 = vst [vmem:[%s2287_s20 + $0x110] sm:$0xff] %v1265_v60  ;;  %v1267_v8 = vadd.f32 %v1011_v61, %v499_v55 }
  0x74   : > { %v761_v7 = vld [vmem:[%s2257_s19 + $0x150] sm:$0xff]  ;;  %v502_v9 = vmul.f32 0.5, %v246_v56  ;;  %v1014_v10 = vmul.f32 0.5, %v758_v57  ;;  %v503_v11 = vmul.f32 0.5, %v247_v58  ;;  %v250_v12 = vld [vmem:[%s2265_s29 + $0x158] sm:$0xff]  ;;  %v251_v14 = vld [vmem:[%s2265_s29 + $0x160] sm:$0xff]  ;;  %v1268_v15 = vadd.f32 %v1012_v2, %v500_v62 }
  0x75   : > { %v762_v13 = vld [vmem:[%s2257_s19 + $0x158] sm:$0xff]  ;;  %1522 = vst [vmem:[%s2287_s20 + $0x118] sm:$0xff] %v1266_v1  ;;  %v1269_v16 = vadd.f32 %v1013_v4, %v501_v3  ;;  %v1015_v17 = vmul.f32 0.5, %v759_v63  ;;  %v504_v18 = vmul.f32 0.5, %v248_v0  ;;  %v763_v19 = vld [vmem:[%s2257_s19 + $0x160] sm:$0xff]  ;;  %v252_v20 = vld [vmem:[%s2265_s29 + $0x168] sm:$0xff] }
  0x76   : > { %1523 = vst [vmem:[%s2287_s20 + $0x120] sm:$0xff] %v1267_v8  ;;  %v1270_v21 = vadd.f32 %v1014_v10, %v502_v9  ;;  %v1016_v22 = vmul.f32 0.5, %v760_v5  ;;  %v505_v23 = vmul.f32 0.5, %v249_v6  ;;  %v1017_v24 = vmul.f32 0.5, %v761_v7  ;;  %v764_v25 = vld [vmem:[%s2257_s19 + $0x168] sm:$0xff]  ;;  %v253_v26 = vld [vmem:[%s2265_s29 + $0x170] sm:$0xff] }
  0x77   : > { %v765_v27 = vld [vmem:[%s2257_s19 + $0x170] sm:$0xff]  ;;  %1524 = vst [vmem:[%s2287_s20 + $0x128] sm:$0xff] %v1268_v15  ;;  %1525 = vst [vmem:[%s2287_s20 + $0x130] sm:$0xff] %v1269_v16  ;;  %v1271_v28 = vadd.f32 %v1015_v17, %v503_v11  ;;  %v506_v29 = vmul.f32 0.5, %v250_v12  ;;  %v1018_v30 = vmul.f32 0.5, %v762_v13  ;;  %v507_v31 = vmul.f32 0.5, %v251_v14 }
  0x78   : > { %v254_v32 = vld [vmem:[%s2265_s29 + $0x178] sm:$0xff]  ;;  %v255_v34 = vld [vmem:[%s2265_s29 + $0x180] sm:$0xff]  ;;  %1526 = vst [vmem:[%s2287_s20 + $0x138] sm:$0xff] %v1270_v21  ;;  %v1272_v35 = vadd.f32 %v1016_v22, %v504_v18  ;;  %v1273_v36 = vadd.f32 %v1017_v24, %v505_v23  ;;  %v1019_v37 = vmul.f32 0.5, %v763_v19  ;;  %v508_v38 = vmul.f32 0.5, %v252_v20  ;;  %v256_v40 = vld [vmem:[%s2265_s29 + $0x188] sm:$0xff] }
  0x79   : > { %v766_v33 = vld [vmem:[%s2257_s19 + $0x178] sm:$0xff]  ;;  %v767_v39 = vld [vmem:[%s2257_s19 + $0x180] sm:$0xff]  ;;  %1527 = vst [vmem:[%s2287_s20 + $0x140] sm:$0xff] %v1271_v28  ;;  %v1274_v41 = vadd.f32 %v1018_v30, %v506_v29  ;;  %v1020_v42 = vmul.f32 0.5, %v764_v25  ;;  %v509_v43 = vmul.f32 0.5, %v253_v26  ;;  %v1021_v44 = vmul.f32 0.5, %v765_v27 }
  0x7a   : > { %v768_v45 = vld [vmem:[%s2257_s19 + $0x188] sm:$0xff]  ;;  %v257_v46 = vld [vmem:[%s2265_s29 + $0x190] sm:$0xff]  ;;  %1528 = vst [vmem:[%s2287_s20 + $0x148] sm:$0xff] %v1272_v35  ;;  %1529 = vst [vmem:[%s2287_s20 + $0x150] sm:$0xff] %v1273_v36  ;;  %v1275_v48 = vadd.f32 %v1019_v37, %v507_v31  ;;  %v510_v49 = vmul.f32 0.5, %v254_v32  ;;  %v1022_v50 = vmul.f32 0.5, %v766_v33 }
  0x7b   : > { %v769_v47 = vld [vmem:[%s2257_s19 + $0x190] sm:$0xff]  ;;  %v511_v51 = vmul.f32 0.5, %v255_v34  ;;  %v258_v52 = vld [vmem:[%s2265_s29 + $0x198] sm:$0xff]  ;;  %v259_v54 = vld [vmem:[%s2265_s29 + $0x1a0] sm:$0xff]  ;;  %1530 = vst [vmem:[%s2287_s20 + $0x158] sm:$0xff] %v1274_v41  ;;  %v1276_v55 = vadd.f32 %v1020_v42, %v508_v38  ;;  %v1277_v56 = vadd.f32 %v1021_v44, %v509_v43  ;;  %v1023_v57 = vmul.f32 0.5, %v767_v39 }
  0x7c   : > { %v770_v53 = vld [vmem:[%s2257_s19 + $0x198] sm:$0xff]  ;;  %v512_v58 = vmul.f32 0.5, %v256_v40  ;;  %v771_v59 = vld [vmem:[%s2257_s19 + $0x1a0] sm:$0xff]  ;;  %v260_v60 = vld [vmem:[%s2265_s29 + $0x1a8] sm:$0xff]  ;;  %1531 = vst [vmem:[%s2287_s20 + $0x160] sm:$0xff] %v1275_v48  ;;  %v1278_v61 = vadd.f32 %v1022_v50, %v510_v49  ;;  %v1024_v62 = vmul.f32 0.5, %v768_v45 }
  0x7d   : > { %v513_v63 = vmul.f32 0.5, %v257_v46  ;;  %v1025_v0 = vmul.f32 0.5, %v769_v47  ;;  %v772_v1 = vld [vmem:[%s2257_s19 + $0x1a8] sm:$0xff]  ;;  %v261_v2 = vld [vmem:[%s2265_s29 + $0x1b0] sm:$0xff]  ;;  %1532 = vst [vmem:[%s2287_s20 + $0x168] sm:$0xff] %v1276_v55  ;;  %1533 = vst [vmem:[%s2287_s20 + $0x170] sm:$0xff] %v1277_v56  ;;  %v1279_v4 = vadd.f32 %v1023_v57, %v511_v51 }
  0x7e   : > { %v773_v3 = vld [vmem:[%s2257_s19 + $0x1b0] sm:$0xff]  ;;  %v514_v5 = vmul.f32 0.5, %v258_v52  ;;  %v1026_v6 = vmul.f32 0.5, %v770_v53  ;;  %v515_v7 = vmul.f32 0.5, %v259_v54  ;;  %v262_v8 = vld [vmem:[%s2265_s29 + $0x1b8] sm:$0xff]  ;;  %v263_v10 = vld [vmem:[%s2265_s29 + $0x1c0] sm:$0xff]  ;;  %v1280_v11 = vadd.f32 %v1024_v62, %v512_v58 }
  0x7f   : > { %v774_v9 = vld [vmem:[%s2257_s19 + $0x1b8] sm:$0xff]  ;;  %1534 = vst [vmem:[%s2287_s20 + $0x178] sm:$0xff] %v1278_v61  ;;  %v1281_v12 = vadd.f32 %v1025_v0, %v513_v63  ;;  %v1027_v13 = vmul.f32 0.5, %v771_v59  ;;  %v516_v14 = vmul.f32 0.5, %v260_v60  ;;  %v775_v15 = vld [vmem:[%s2257_s19 + $0x1c0] sm:$0xff]  ;;  %v264_v16 = vld [vmem:[%s2265_s29 + $0x1c8] sm:$0xff] }
  0x80   : > { %1535 = vst [vmem:[%s2287_s20 + $0x180] sm:$0xff] %v1279_v4  ;;  %v1282_v17 = vadd.f32 %v1026_v6, %v514_v5  ;;  %v1028_v18 = vmul.f32 0.5, %v772_v1  ;;  %v517_v19 = vmul.f32 0.5, %v261_v2  ;;  %v1029_v20 = vmul.f32 0.5, %v773_v3  ;;  %v776_v21 = vld [vmem:[%s2257_s19 + $0x1c8] sm:$0xff]  ;;  %v265_v22 = vld [vmem:[%s2265_s29 + $0x1d0] sm:$0xff] }
  0x81   : > { %v777_v23 = vld [vmem:[%s2257_s19 + $0x1d0] sm:$0xff]  ;;  %1536 = vst [vmem:[%s2287_s20 + $0x188] sm:$0xff] %v1280_v11  ;;  %1537 = vst [vmem:[%s2287_s20 + $0x190] sm:$0xff] %v1281_v12  ;;  %v1283_v24 = vadd.f32 %v1027_v13, %v515_v7  ;;  %v518_v25 = vmul.f32 0.5, %v262_v8  ;;  %v1030_v26 = vmul.f32 0.5, %v774_v9  ;;  %v519_v27 = vmul.f32 0.5, %v263_v10 }
  0x82   : > { %v266_v28 = vld [vmem:[%s2265_s29 + $0x1d8] sm:$0xff]  ;;  %v267_v30 = vld [vmem:[%s2265_s29 + $0x1e0] sm:$0xff]  ;;  %1538 = vst [vmem:[%s2287_s20 + $0x198] sm:$0xff] %v1282_v17  ;;  %v1284_v31 = vadd.f32 %v1028_v18, %v516_v14  ;;  %v1285_v32 = vadd.f32 %v1029_v20, %v517_v19  ;;  %v1031_v33 = vmul.f32 0.5, %v775_v15  ;;  %v520_v34 = vmul.f32 0.5, %v264_v16  ;;  %v268_v36 = vld [vmem:[%s2265_s29 + $0x1e8] sm:$0xff] }
  0x83   : > { %v778_v29 = vld [vmem:[%s2257_s19 + $0x1d8] sm:$0xff]  ;;  %v779_v35 = vld [vmem:[%s2257_s19 + $0x1e0] sm:$0xff]  ;;  %1539 = vst [vmem:[%s2287_s20 + $0x1a0] sm:$0xff] %v1283_v24  ;;  %v1286_v37 = vadd.f32 %v1030_v26, %v518_v25  ;;  %v1032_v38 = vmul.f32 0.5, %v776_v21  ;;  %v521_v39 = vmul.f32 0.5, %v265_v22  ;;  %v1033_v40 = vmul.f32 0.5, %v777_v23 }
  0x84   : > { %v780_v41 = vld [vmem:[%s2257_s19 + $0x1e8] sm:$0xff]  ;;  %v269_v42 = vld [vmem:[%s2265_s29 + $0x1f0] sm:$0xff]  ;;  %1540 = vst [vmem:[%s2287_s20 + $0x1a8] sm:$0xff] %v1284_v31  ;;  %1541 = vst [vmem:[%s2287_s20 + $0x1b0] sm:$0xff] %v1285_v32  ;;  %v1287_v44 = vadd.f32 %v1031_v33, %v519_v27  ;;  %v522_v45 = vmul.f32 0.5, %v266_v28  ;;  %v1034_v46 = vmul.f32 0.5, %v778_v29 }
  0x85   : > { %v781_v43 = vld [vmem:[%s2257_s19 + $0x1f0] sm:$0xff]  ;;  %v523_v47 = vmul.f32 0.5, %v267_v30  ;;  %v270_v48 = vld [vmem:[%s2265_s29 + $0x1f8] sm:$0xff]  ;;  %v271_v50 = vld [vmem:[%s2265_s29 + $0x200] sm:$0xff]  ;;  %1542 = vst [vmem:[%s2287_s20 + $0x1b8] sm:$0xff] %v1286_v37  ;;  %v1288_v51 = vadd.f32 %v1032_v38, %v520_v34  ;;  %v1289_v52 = vadd.f32 %v1033_v40, %v521_v39  ;;  %v1035_v53 = vmul.f32 0.5, %v779_v35 }
  0x86   : > { %v782_v49 = vld [vmem:[%s2257_s19 + $0x1f8] sm:$0xff]  ;;  %v524_v54 = vmul.f32 0.5, %v268_v36  ;;  %v783_v55 = vld [vmem:[%s2257_s19 + $0x200] sm:$0xff]  ;;  %v272_v56 = vld [vmem:[%s2265_s29 + $0x208] sm:$0xff]  ;;  %1543 = vst [vmem:[%s2287_s20 + $0x1c0] sm:$0xff] %v1287_v44  ;;  %v1290_v57 = vadd.f32 %v1034_v46, %v522_v45  ;;  %v1036_v58 = vmul.f32 0.5, %v780_v41 }
  0x87   : > { %v525_v59 = vmul.f32 0.5, %v269_v42  ;;  %v1037_v60 = vmul.f32 0.5, %v781_v43  ;;  %v784_v61 = vld [vmem:[%s2257_s19 + $0x208] sm:$0xff]  ;;  %v273_v62 = vld [vmem:[%s2265_s29 + $0x210] sm:$0xff]  ;;  %1544 = vst [vmem:[%s2287_s20 + $0x1c8] sm:$0xff] %v1288_v51  ;;  %1545 = vst [vmem:[%s2287_s20 + $0x1d0] sm:$0xff] %v1289_v52  ;;  %v1291_v0 = vadd.f32 %v1035_v53, %v523_v47 }
  0x88   : > { %v785_v63 = vld [vmem:[%s2257_s19 + $0x210] sm:$0xff]  ;;  %v526_v1 = vmul.f32 0.5, %v270_v48  ;;  %v1038_v2 = vmul.f32 0.5, %v782_v49  ;;  %v527_v3 = vmul.f32 0.5, %v271_v50  ;;  %v274_v4 = vld [vmem:[%s2265_s29 + $0x218] sm:$0xff]  ;;  %v275_v6 = vld [vmem:[%s2265_s29 + $0x220] sm:$0xff]  ;;  %v1292_v7 = vadd.f32 %v1036_v58, %v524_v54 }
  0x89   : > { %v786_v5 = vld [vmem:[%s2257_s19 + $0x218] sm:$0xff]  ;;  %1546 = vst [vmem:[%s2287_s20 + $0x1d8] sm:$0xff] %v1290_v57  ;;  %v1293_v8 = vadd.f32 %v1037_v60, %v525_v59  ;;  %v1039_v9 = vmul.f32 0.5, %v783_v55  ;;  %v528_v10 = vmul.f32 0.5, %v272_v56  ;;  %v787_v11 = vld [vmem:[%s2257_s19 + $0x220] sm:$0xff]  ;;  %v276_v12 = vld [vmem:[%s2265_s29 + $0x228] sm:$0xff] }
  0x8a   : > { %1547 = vst [vmem:[%s2287_s20 + $0x1e0] sm:$0xff] %v1291_v0  ;;  %v1294_v13 = vadd.f32 %v1038_v2, %v526_v1  ;;  %v1040_v14 = vmul.f32 0.5, %v784_v61  ;;  %v529_v15 = vmul.f32 0.5, %v273_v62  ;;  %v1041_v16 = vmul.f32 0.5, %v785_v63  ;;  %v788_v17 = vld [vmem:[%s2257_s19 + $0x228] sm:$0xff]  ;;  %v277_v18 = vld [vmem:[%s2265_s29 + $0x230] sm:$0xff] }
  0x8b   : > { %v789_v19 = vld [vmem:[%s2257_s19 + $0x230] sm:$0xff]  ;;  %1548 = vst [vmem:[%s2287_s20 + $0x1e8] sm:$0xff] %v1292_v7  ;;  %1549 = vst [vmem:[%s2287_s20 + $0x1f0] sm:$0xff] %v1293_v8  ;;  %v1295_v20 = vadd.f32 %v1039_v9, %v527_v3  ;;  %v530_v21 = vmul.f32 0.5, %v274_v4  ;;  %v1042_v22 = vmul.f32 0.5, %v786_v5  ;;  %v531_v23 = vmul.f32 0.5, %v275_v6 }
  0x8c   : > { %v278_v24 = vld [vmem:[%s2265_s29 + $0x238] sm:$0xff]  ;;  %v279_v26 = vld [vmem:[%s2265_s29 + $0x240] sm:$0xff]  ;;  %1550 = vst [vmem:[%s2287_s20 + $0x1f8] sm:$0xff] %v1294_v13  ;;  %v1296_v27 = vadd.f32 %v1040_v14, %v528_v10  ;;  %v1297_v28 = vadd.f32 %v1041_v16, %v529_v15  ;;  %v1043_v29 = vmul.f32 0.5, %v787_v11  ;;  %v532_v30 = vmul.f32 0.5, %v276_v12  ;;  %v280_v32 = vld [vmem:[%s2265_s29 + $0x248] sm:$0xff] }
  0x8d   : > { %v790_v25 = vld [vmem:[%s2257_s19 + $0x238] sm:$0xff]  ;;  %v791_v31 = vld [vmem:[%s2257_s19 + $0x240] sm:$0xff]  ;;  %1551 = vst [vmem:[%s2287_s20 + $0x200] sm:$0xff] %v1295_v20  ;;  %v1298_v33 = vadd.f32 %v1042_v22, %v530_v21  ;;  %v1044_v34 = vmul.f32 0.5, %v788_v17  ;;  %v533_v35 = vmul.f32 0.5, %v277_v18  ;;  %v1045_v36 = vmul.f32 0.5, %v789_v19 }
  0x8e   : > { %v792_v37 = vld [vmem:[%s2257_s19 + $0x248] sm:$0xff]  ;;  %v281_v38 = vld [vmem:[%s2265_s29 + $0x250] sm:$0xff]  ;;  %1552 = vst [vmem:[%s2287_s20 + $0x208] sm:$0xff] %v1296_v27  ;;  %1553 = vst [vmem:[%s2287_s20 + $0x210] sm:$0xff] %v1297_v28  ;;  %v1299_v40 = vadd.f32 %v1043_v29, %v531_v23  ;;  %v534_v41 = vmul.f32 0.5, %v278_v24  ;;  %v1046_v42 = vmul.f32 0.5, %v790_v25 }
  0x8f   : > { %v793_v39 = vld [vmem:[%s2257_s19 + $0x250] sm:$0xff]  ;;  %v535_v43 = vmul.f32 0.5, %v279_v26  ;;  %v282_v44 = vld [vmem:[%s2265_s29 + $0x258] sm:$0xff]  ;;  %v283_v46 = vld [vmem:[%s2265_s29 + $0x260] sm:$0xff]  ;;  %1554 = vst [vmem:[%s2287_s20 + $0x218] sm:$0xff] %v1298_v33  ;;  %v1300_v47 = vadd.f32 %v1044_v34, %v532_v30  ;;  %v1301_v48 = vadd.f32 %v1045_v36, %v533_v35  ;;  %v1047_v49 = vmul.f32 0.5, %v791_v31 }
  0x90   : > { %v794_v45 = vld [vmem:[%s2257_s19 + $0x258] sm:$0xff]  ;;  %v536_v50 = vmul.f32 0.5, %v280_v32  ;;  %v795_v51 = vld [vmem:[%s2257_s19 + $0x260] sm:$0xff]  ;;  %v284_v52 = vld [vmem:[%s2265_s29 + $0x268] sm:$0xff]  ;;  %1555 = vst [vmem:[%s2287_s20 + $0x220] sm:$0xff] %v1299_v40  ;;  %v1302_v53 = vadd.f32 %v1046_v42, %v534_v41  ;;  %v1048_v54 = vmul.f32 0.5, %v792_v37 }
  0x91   : > { %v537_v55 = vmul.f32 0.5, %v281_v38  ;;  %v1049_v56 = vmul.f32 0.5, %v793_v39  ;;  %v796_v57 = vld [vmem:[%s2257_s19 + $0x268] sm:$0xff]  ;;  %v285_v58 = vld [vmem:[%s2265_s29 + $0x270] sm:$0xff]  ;;  %1556 = vst [vmem:[%s2287_s20 + $0x228] sm:$0xff] %v1300_v47  ;;  %1557 = vst [vmem:[%s2287_s20 + $0x230] sm:$0xff] %v1301_v48  ;;  %v1303_v60 = vadd.f32 %v1047_v49, %v535_v43 }
  0x92   : > { %v797_v59 = vld [vmem:[%s2257_s19 + $0x270] sm:$0xff]  ;;  %v538_v61 = vmul.f32 0.5, %v282_v44  ;;  %v1050_v62 = vmul.f32 0.5, %v794_v45  ;;  %v539_v63 = vmul.f32 0.5, %v283_v46  ;;  %v286_v0 = vld [vmem:[%s2265_s29 + $0x278] sm:$0xff]  ;;  %v287_v2 = vld [vmem:[%s2265_s29 + $0x280] sm:$0xff]  ;;  %v1304_v3 = vadd.f32 %v1048_v54, %v536_v50 }
  0x93   : > { %v798_v1 = vld [vmem:[%s2257_s19 + $0x278] sm:$0xff]  ;;  %1558 = vst [vmem:[%s2287_s20 + $0x238] sm:$0xff] %v1302_v53  ;;  %v1305_v4 = vadd.f32 %v1049_v56, %v537_v55  ;;  %v1051_v5 = vmul.f32 0.5, %v795_v51  ;;  %v540_v6 = vmul.f32 0.5, %v284_v52  ;;  %v799_v7 = vld [vmem:[%s2257_s19 + $0x280] sm:$0xff]  ;;  %v288_v8 = vld [vmem:[%s2265_s29 + $0x288] sm:$0xff] }
  0x94   : > { %1559 = vst [vmem:[%s2287_s20 + $0x240] sm:$0xff] %v1303_v60  ;;  %v1306_v9 = vadd.f32 %v1050_v62, %v538_v61  ;;  %v1052_v10 = vmul.f32 0.5, %v796_v57  ;;  %v541_v11 = vmul.f32 0.5, %v285_v58  ;;  %v1053_v12 = vmul.f32 0.5, %v797_v59  ;;  %v800_v13 = vld [vmem:[%s2257_s19 + $0x288] sm:$0xff]  ;;  %v289_v14 = vld [vmem:[%s2265_s29 + $0x290] sm:$0xff] }
  0x95   : > { %v801_v15 = vld [vmem:[%s2257_s19 + $0x290] sm:$0xff]  ;;  %1560 = vst [vmem:[%s2287_s20 + $0x248] sm:$0xff] %v1304_v3  ;;  %1561 = vst [vmem:[%s2287_s20 + $0x250] sm:$0xff] %v1305_v4  ;;  %v1307_v16 = vadd.f32 %v1051_v5, %v539_v63  ;;  %v542_v17 = vmul.f32 0.5, %v286_v0  ;;  %v1054_v18 = vmul.f32 0.5, %v798_v1  ;;  %v543_v19 = vmul.f32 0.5, %v287_v2 }
  0x96   : > { %v290_v20 = vld [vmem:[%s2265_s29 + $0x298] sm:$0xff]  ;;  %v291_v22 = vld [vmem:[%s2265_s29 + $0x2a0] sm:$0xff]  ;;  %1562 = vst [vmem:[%s2287_s20 + $0x258] sm:$0xff] %v1306_v9  ;;  %v1308_v23 = vadd.f32 %v1052_v10, %v540_v6  ;;  %v1309_v24 = vadd.f32 %v1053_v12, %v541_v11  ;;  %v1055_v25 = vmul.f32 0.5, %v799_v7  ;;  %v544_v26 = vmul.f32 0.5, %v288_v8  ;;  %v292_v28 = vld [vmem:[%s2265_s29 + $0x2a8] sm:$0xff] }
  0x97   : > { %v802_v21 = vld [vmem:[%s2257_s19 + $0x298] sm:$0xff]  ;;  %v803_v27 = vld [vmem:[%s2257_s19 + $0x2a0] sm:$0xff]  ;;  %1563 = vst [vmem:[%s2287_s20 + $0x260] sm:$0xff] %v1307_v16  ;;  %v1310_v29 = vadd.f32 %v1054_v18, %v542_v17  ;;  %v1056_v30 = vmul.f32 0.5, %v800_v13  ;;  %v545_v31 = vmul.f32 0.5, %v289_v14  ;;  %v1057_v32 = vmul.f32 0.5, %v801_v15 }
  0x98   : > { %v804_v33 = vld [vmem:[%s2257_s19 + $0x2a8] sm:$0xff]  ;;  %v293_v34 = vld [vmem:[%s2265_s29 + $0x2b0] sm:$0xff]  ;;  %1564 = vst [vmem:[%s2287_s20 + $0x268] sm:$0xff] %v1308_v23  ;;  %1565 = vst [vmem:[%s2287_s20 + $0x270] sm:$0xff] %v1309_v24  ;;  %v1311_v36 = vadd.f32 %v1055_v25, %v543_v19  ;;  %v546_v37 = vmul.f32 0.5, %v290_v20  ;;  %v1058_v38 = vmul.f32 0.5, %v802_v21 }
  0x99   : > { %v805_v35 = vld [vmem:[%s2257_s19 + $0x2b0] sm:$0xff]  ;;  %v547_v39 = vmul.f32 0.5, %v291_v22  ;;  %v294_v40 = vld [vmem:[%s2265_s29 + $0x2b8] sm:$0xff]  ;;  %v295_v42 = vld [vmem:[%s2265_s29 + $0x2c0] sm:$0xff]  ;;  %1566 = vst [vmem:[%s2287_s20 + $0x278] sm:$0xff] %v1310_v29  ;;  %v1312_v43 = vadd.f32 %v1056_v30, %v544_v26  ;;  %v1313_v44 = vadd.f32 %v1057_v32, %v545_v31  ;;  %v1059_v45 = vmul.f32 0.5, %v803_v27 }
  0x9a   : > { %v806_v41 = vld [vmem:[%s2257_s19 + $0x2b8] sm:$0xff]  ;;  %v548_v46 = vmul.f32 0.5, %v292_v28  ;;  %v807_v47 = vld [vmem:[%s2257_s19 + $0x2c0] sm:$0xff]  ;;  %v296_v48 = vld [vmem:[%s2265_s29 + $0x2c8] sm:$0xff]  ;;  %1567 = vst [vmem:[%s2287_s20 + $0x280] sm:$0xff] %v1311_v36  ;;  %v1314_v49 = vadd.f32 %v1058_v38, %v546_v37  ;;  %v1060_v50 = vmul.f32 0.5, %v804_v33 }
  0x9b   : > { %v549_v51 = vmul.f32 0.5, %v293_v34  ;;  %v1061_v52 = vmul.f32 0.5, %v805_v35  ;;  %v808_v53 = vld [vmem:[%s2257_s19 + $0x2c8] sm:$0xff]  ;;  %v297_v54 = vld [vmem:[%s2265_s29 + $0x2d0] sm:$0xff]  ;;  %1568 = vst [vmem:[%s2287_s20 + $0x288] sm:$0xff] %v1312_v43  ;;  %1569 = vst [vmem:[%s2287_s20 + $0x290] sm:$0xff] %v1313_v44  ;;  %v1315_v56 = vadd.f32 %v1059_v45, %v547_v39 }
  0x9c   : > { %v809_v55 = vld [vmem:[%s2257_s19 + $0x2d0] sm:$0xff]  ;;  %v550_v57 = vmul.f32 0.5, %v294_v40  ;;  %v1062_v58 = vmul.f32 0.5, %v806_v41  ;;  %v551_v59 = vmul.f32 0.5, %v295_v42  ;;  %v298_v60 = vld [vmem:[%s2265_s29 + $0x2d8] sm:$0xff]  ;;  %v299_v62 = vld [vmem:[%s2265_s29 + $0x2e0] sm:$0xff]  ;;  %v1316_v63 = vadd.f32 %v1060_v50, %v548_v46 }
  0x9d   : > { %v810_v61 = vld [vmem:[%s2257_s19 + $0x2d8] sm:$0xff]  ;;  %1570 = vst [vmem:[%s2287_s20 + $0x298] sm:$0xff] %v1314_v49  ;;  %v1317_v0 = vadd.f32 %v1061_v52, %v549_v51  ;;  %v1063_v1 = vmul.f32 0.5, %v807_v47  ;;  %v552_v2 = vmul.f32 0.5, %v296_v48  ;;  %v811_v3 = vld [vmem:[%s2257_s19 + $0x2e0] sm:$0xff]  ;;  %v300_v4 = vld [vmem:[%s2265_s29 + $0x2e8] sm:$0xff] }
  0x9e   : > { %1571 = vst [vmem:[%s2287_s20 + $0x2a0] sm:$0xff] %v1315_v56  ;;  %v1318_v5 = vadd.f32 %v1062_v58, %v550_v57  ;;  %v1064_v6 = vmul.f32 0.5, %v808_v53  ;;  %v553_v7 = vmul.f32 0.5, %v297_v54  ;;  %v1065_v8 = vmul.f32 0.5, %v809_v55  ;;  %v812_v9 = vld [vmem:[%s2257_s19 + $0x2e8] sm:$0xff]  ;;  %v301_v10 = vld [vmem:[%s2265_s29 + $0x2f0] sm:$0xff] }
  0x9f   : > { %v813_v11 = vld [vmem:[%s2257_s19 + $0x2f0] sm:$0xff]  ;;  %1572 = vst [vmem:[%s2287_s20 + $0x2a8] sm:$0xff] %v1316_v63  ;;  %1573 = vst [vmem:[%s2287_s20 + $0x2b0] sm:$0xff] %v1317_v0  ;;  %v1319_v12 = vadd.f32 %v1063_v1, %v551_v59  ;;  %v554_v13 = vmul.f32 0.5, %v298_v60  ;;  %v1066_v14 = vmul.f32 0.5, %v810_v61  ;;  %v555_v15 = vmul.f32 0.5, %v299_v62 }
  0xa0   : > { %v302_v16 = vld [vmem:[%s2265_s29 + $0x2f8] sm:$0xff]  ;;  %v303_v18 = vld [vmem:[%s2265_s29 + $0x300] sm:$0xff]  ;;  %1574 = vst [vmem:[%s2287_s20 + $0x2b8] sm:$0xff] %v1318_v5  ;;  %v1320_v19 = vadd.f32 %v1064_v6, %v552_v2  ;;  %v1321_v20 = vadd.f32 %v1065_v8, %v553_v7  ;;  %v1067_v21 = vmul.f32 0.5, %v811_v3  ;;  %v556_v22 = vmul.f32 0.5, %v300_v4  ;;  %v304_v24 = vld [vmem:[%s2265_s29 + $0x308] sm:$0xff] }
  0xa1   : > { %v814_v17 = vld [vmem:[%s2257_s19 + $0x2f8] sm:$0xff]  ;;  %v815_v23 = vld [vmem:[%s2257_s19 + $0x300] sm:$0xff]  ;;  %1575 = vst [vmem:[%s2287_s20 + $0x2c0] sm:$0xff] %v1319_v12  ;;  %v1322_v25 = vadd.f32 %v1066_v14, %v554_v13  ;;  %v1068_v26 = vmul.f32 0.5, %v812_v9  ;;  %v557_v27 = vmul.f32 0.5, %v301_v10  ;;  %v1069_v28 = vmul.f32 0.5, %v813_v11 }
  0xa2   : > { %v816_v29 = vld [vmem:[%s2257_s19 + $0x308] sm:$0xff]  ;;  %v305_v30 = vld [vmem:[%s2265_s29 + $0x310] sm:$0xff]  ;;  %1576 = vst [vmem:[%s2287_s20 + $0x2c8] sm:$0xff] %v1320_v19  ;;  %1577 = vst [vmem:[%s2287_s20 + $0x2d0] sm:$0xff] %v1321_v20  ;;  %v1323_v32 = vadd.f32 %v1067_v21, %v555_v15  ;;  %v558_v33 = vmul.f32 0.5, %v302_v16  ;;  %v1070_v34 = vmul.f32 0.5, %v814_v17 }
  0xa3   : > { %v817_v31 = vld [vmem:[%s2257_s19 + $0x310] sm:$0xff]  ;;  %v559_v35 = vmul.f32 0.5, %v303_v18  ;;  %v306_v36 = vld [vmem:[%s2265_s29 + $0x318] sm:$0xff]  ;;  %v307_v38 = vld [vmem:[%s2265_s29 + $0x320] sm:$0xff]  ;;  %1578 = vst [vmem:[%s2287_s20 + $0x2d8] sm:$0xff] %v1322_v25  ;;  %v1324_v39 = vadd.f32 %v1068_v26, %v556_v22  ;;  %v1325_v40 = vadd.f32 %v1069_v28, %v557_v27  ;;  %v1071_v41 = vmul.f32 0.5, %v815_v23 }
  0xa4   : > { %v818_v37 = vld [vmem:[%s2257_s19 + $0x318] sm:$0xff]  ;;  %v560_v42 = vmul.f32 0.5, %v304_v24  ;;  %v819_v43 = vld [vmem:[%s2257_s19 + $0x320] sm:$0xff]  ;;  %v308_v44 = vld [vmem:[%s2265_s29 + $0x328] sm:$0xff]  ;;  %1579 = vst [vmem:[%s2287_s20 + $0x2e0] sm:$0xff] %v1323_v32  ;;  %v1326_v45 = vadd.f32 %v1070_v34, %v558_v33  ;;  %v1072_v46 = vmul.f32 0.5, %v816_v29 }
  0xa5   : > { %v561_v47 = vmul.f32 0.5, %v305_v30  ;;  %v1073_v48 = vmul.f32 0.5, %v817_v31  ;;  %v820_v49 = vld [vmem:[%s2257_s19 + $0x328] sm:$0xff]  ;;  %v309_v50 = vld [vmem:[%s2265_s29 + $0x330] sm:$0xff]  ;;  %1580 = vst [vmem:[%s2287_s20 + $0x2e8] sm:$0xff] %v1324_v39  ;;  %1581 = vst [vmem:[%s2287_s20 + $0x2f0] sm:$0xff] %v1325_v40  ;;  %v1327_v52 = vadd.f32 %v1071_v41, %v559_v35 }
  0xa6   : > { %v821_v51 = vld [vmem:[%s2257_s19 + $0x330] sm:$0xff]  ;;  %v562_v53 = vmul.f32 0.5, %v306_v36  ;;  %v1074_v54 = vmul.f32 0.5, %v818_v37  ;;  %v563_v55 = vmul.f32 0.5, %v307_v38  ;;  %v310_v56 = vld [vmem:[%s2265_s29 + $0x338] sm:$0xff]  ;;  %v311_v58 = vld [vmem:[%s2265_s29 + $0x340] sm:$0xff]  ;;  %v1328_v59 = vadd.f32 %v1072_v46, %v560_v42 }
  0xa7   : > { %v822_v57 = vld [vmem:[%s2257_s19 + $0x338] sm:$0xff]  ;;  %1582 = vst [vmem:[%s2287_s20 + $0x2f8] sm:$0xff] %v1326_v45  ;;  %v1329_v60 = vadd.f32 %v1073_v48, %v561_v47  ;;  %v1075_v61 = vmul.f32 0.5, %v819_v43  ;;  %v564_v62 = vmul.f32 0.5, %v308_v44  ;;  %v823_v63 = vld [vmem:[%s2257_s19 + $0x340] sm:$0xff]  ;;  %v312_v0 = vld [vmem:[%s2265_s29 + $0x348] sm:$0xff] }
  0xa8   : > { %1583 = vst [vmem:[%s2287_s20 + $0x300] sm:$0xff] %v1327_v52  ;;  %v1330_v1 = vadd.f32 %v1074_v54, %v562_v53  ;;  %v1076_v2 = vmul.f32 0.5, %v820_v49  ;;  %v565_v3 = vmul.f32 0.5, %v309_v50  ;;  %v1077_v4 = vmul.f32 0.5, %v821_v51  ;;  %v824_v5 = vld [vmem:[%s2257_s19 + $0x348] sm:$0xff]  ;;  %v313_v6 = vld [vmem:[%s2265_s29 + $0x350] sm:$0xff] }
  0xa9   : > { %v825_v7 = vld [vmem:[%s2257_s19 + $0x350] sm:$0xff]  ;;  %1584 = vst [vmem:[%s2287_s20 + $0x308] sm:$0xff] %v1328_v59  ;;  %1585 = vst [vmem:[%s2287_s20 + $0x310] sm:$0xff] %v1329_v60  ;;  %v1331_v8 = vadd.f32 %v1075_v61, %v563_v55  ;;  %v566_v9 = vmul.f32 0.5, %v310_v56  ;;  %v1078_v10 = vmul.f32 0.5, %v822_v57  ;;  %v567_v11 = vmul.f32 0.5, %v311_v58 }
  0xaa   : > { %v314_v12 = vld [vmem:[%s2265_s29 + $0x358] sm:$0xff]  ;;  %v315_v14 = vld [vmem:[%s2265_s29 + $0x360] sm:$0xff]  ;;  %1586 = vst [vmem:[%s2287_s20 + $0x318] sm:$0xff] %v1330_v1  ;;  %v1332_v15 = vadd.f32 %v1076_v2, %v564_v62  ;;  %v1333_v16 = vadd.f32 %v1077_v4, %v565_v3  ;;  %v1079_v17 = vmul.f32 0.5, %v823_v63  ;;  %v568_v18 = vmul.f32 0.5, %v312_v0  ;;  %v316_v20 = vld [vmem:[%s2265_s29 + $0x368] sm:$0xff] }
  0xab   : > { %v826_v13 = vld [vmem:[%s2257_s19 + $0x358] sm:$0xff]  ;;  %v827_v19 = vld [vmem:[%s2257_s19 + $0x360] sm:$0xff]  ;;  %1587 = vst [vmem:[%s2287_s20 + $0x320] sm:$0xff] %v1331_v8  ;;  %v1334_v21 = vadd.f32 %v1078_v10, %v566_v9  ;;  %v1080_v22 = vmul.f32 0.5, %v824_v5  ;;  %v569_v23 = vmul.f32 0.5, %v313_v6  ;;  %v1081_v24 = vmul.f32 0.5, %v825_v7 }
  0xac   : > { %v828_v25 = vld [vmem:[%s2257_s19 + $0x368] sm:$0xff]  ;;  %v317_v26 = vld [vmem:[%s2265_s29 + $0x370] sm:$0xff]  ;;  %1588 = vst [vmem:[%s2287_s20 + $0x328] sm:$0xff] %v1332_v15  ;;  %1589 = vst [vmem:[%s2287_s20 + $0x330] sm:$0xff] %v1333_v16  ;;  %v1335_v28 = vadd.f32 %v1079_v17, %v567_v11  ;;  %v570_v29 = vmul.f32 0.5, %v314_v12  ;;  %v1082_v30 = vmul.f32 0.5, %v826_v13 }
  0xad   : > { %v829_v27 = vld [vmem:[%s2257_s19 + $0x370] sm:$0xff]  ;;  %v571_v31 = vmul.f32 0.5, %v315_v14  ;;  %v318_v32 = vld [vmem:[%s2265_s29 + $0x378] sm:$0xff]  ;;  %v319_v34 = vld [vmem:[%s2265_s29 + $0x380] sm:$0xff]  ;;  %1590 = vst [vmem:[%s2287_s20 + $0x338] sm:$0xff] %v1334_v21  ;;  %v1336_v35 = vadd.f32 %v1080_v22, %v568_v18  ;;  %v1337_v36 = vadd.f32 %v1081_v24, %v569_v23  ;;  %v1083_v37 = vmul.f32 0.5, %v827_v19 }
  0xae   : > { %v830_v33 = vld [vmem:[%s2257_s19 + $0x378] sm:$0xff]  ;;  %v572_v38 = vmul.f32 0.5, %v316_v20  ;;  %v831_v39 = vld [vmem:[%s2257_s19 + $0x380] sm:$0xff]  ;;  %v320_v40 = vld [vmem:[%s2265_s29 + $0x388] sm:$0xff]  ;;  %1591 = vst [vmem:[%s2287_s20 + $0x340] sm:$0xff] %v1335_v28  ;;  %v1338_v41 = vadd.f32 %v1082_v30, %v570_v29  ;;  %v1084_v42 = vmul.f32 0.5, %v828_v25 }
  0xaf   : > { %v573_v43 = vmul.f32 0.5, %v317_v26  ;;  %v1085_v44 = vmul.f32 0.5, %v829_v27  ;;  %v832_v45 = vld [vmem:[%s2257_s19 + $0x388] sm:$0xff]  ;;  %v321_v46 = vld [vmem:[%s2265_s29 + $0x390] sm:$0xff]  ;;  %1592 = vst [vmem:[%s2287_s20 + $0x348] sm:$0xff] %v1336_v35  ;;  %1593 = vst [vmem:[%s2287_s20 + $0x350] sm:$0xff] %v1337_v36  ;;  %v1339_v48 = vadd.f32 %v1083_v37, %v571_v31 }
  0xb0   : > { %v833_v47 = vld [vmem:[%s2257_s19 + $0x390] sm:$0xff]  ;;  %v574_v49 = vmul.f32 0.5, %v318_v32  ;;  %v1086_v50 = vmul.f32 0.5, %v830_v33  ;;  %v575_v51 = vmul.f32 0.5, %v319_v34  ;;  %v322_v52 = vld [vmem:[%s2265_s29 + $0x398] sm:$0xff]  ;;  %v323_v54 = vld [vmem:[%s2265_s29 + $0x3a0] sm:$0xff]  ;;  %v1340_v55 = vadd.f32 %v1084_v42, %v572_v38 }
  0xb1   : > { %v834_v53 = vld [vmem:[%s2257_s19 + $0x398] sm:$0xff]  ;;  %1594 = vst [vmem:[%s2287_s20 + $0x358] sm:$0xff] %v1338_v41  ;;  %v1341_v56 = vadd.f32 %v1085_v44, %v573_v43  ;;  %v1087_v57 = vmul.f32 0.5, %v831_v39  ;;  %v576_v58 = vmul.f32 0.5, %v320_v40  ;;  %v835_v59 = vld [vmem:[%s2257_s19 + $0x3a0] sm:$0xff]  ;;  %v324_v60 = vld [vmem:[%s2265_s29 + $0x3a8] sm:$0xff] }
  0xb2   : > { %1595 = vst [vmem:[%s2287_s20 + $0x360] sm:$0xff] %v1339_v48  ;;  %v1342_v61 = vadd.f32 %v1086_v50, %v574_v49  ;;  %v1088_v62 = vmul.f32 0.5, %v832_v45  ;;  %v577_v63 = vmul.f32 0.5, %v321_v46  ;;  %v1089_v0 = vmul.f32 0.5, %v833_v47  ;;  %v836_v1 = vld [vmem:[%s2257_s19 + $0x3a8] sm:$0xff]  ;;  %v325_v2 = vld [vmem:[%s2265_s29 + $0x3b0] sm:$0xff] }
  0xb3   : > { %v837_v3 = vld [vmem:[%s2257_s19 + $0x3b0] sm:$0xff]  ;;  %1596 = vst [vmem:[%s2287_s20 + $0x368] sm:$0xff] %v1340_v55  ;;  %1597 = vst [vmem:[%s2287_s20 + $0x370] sm:$0xff] %v1341_v56  ;;  %v1343_v4 = vadd.f32 %v1087_v57, %v575_v51  ;;  %v578_v5 = vmul.f32 0.5, %v322_v52  ;;  %v1090_v6 = vmul.f32 0.5, %v834_v53  ;;  %v579_v7 = vmul.f32 0.5, %v323_v54 }
  0xb4   : > { %v326_v8 = vld [vmem:[%s2265_s29 + $0x3b8] sm:$0xff]  ;;  %v327_v10 = vld [vmem:[%s2265_s29 + $0x3c0] sm:$0xff]  ;;  %1598 = vst [vmem:[%s2287_s20 + $0x378] sm:$0xff] %v1342_v61  ;;  %v1344_v11 = vadd.f32 %v1088_v62, %v576_v58  ;;  %v1345_v12 = vadd.f32 %v1089_v0, %v577_v63  ;;  %v1091_v13 = vmul.f32 0.5, %v835_v59  ;;  %v580_v14 = vmul.f32 0.5, %v324_v60  ;;  %v328_v16 = vld [vmem:[%s2265_s29 + $0x3c8] sm:$0xff] }
  0xb5   : > { %v838_v9 = vld [vmem:[%s2257_s19 + $0x3b8] sm:$0xff]  ;;  %v839_v15 = vld [vmem:[%s2257_s19 + $0x3c0] sm:$0xff]  ;;  %1599 = vst [vmem:[%s2287_s20 + $0x380] sm:$0xff] %v1343_v4  ;;  %v1346_v17 = vadd.f32 %v1090_v6, %v578_v5  ;;  %v1092_v18 = vmul.f32 0.5, %v836_v1  ;;  %v581_v19 = vmul.f32 0.5, %v325_v2  ;;  %v1093_v20 = vmul.f32 0.5, %v837_v3 }
  0xb6   : > { %v840_v21 = vld [vmem:[%s2257_s19 + $0x3c8] sm:$0xff]  ;;  %v329_v22 = vld [vmem:[%s2265_s29 + $0x3d0] sm:$0xff]  ;;  %1600 = vst [vmem:[%s2287_s20 + $0x388] sm:$0xff] %v1344_v11  ;;  %1601 = vst [vmem:[%s2287_s20 + $0x390] sm:$0xff] %v1345_v12  ;;  %v1347_v24 = vadd.f32 %v1091_v13, %v579_v7  ;;  %v582_v25 = vmul.f32 0.5, %v326_v8  ;;  %v1094_v26 = vmul.f32 0.5, %v838_v9 }
  0xb7   : > { %v841_v23 = vld [vmem:[%s2257_s19 + $0x3d0] sm:$0xff]  ;;  %v583_v27 = vmul.f32 0.5, %v327_v10  ;;  %v330_v28 = vld [vmem:[%s2265_s29 + $0x3d8] sm:$0xff]  ;;  %v331_v30 = vld [vmem:[%s2265_s29 + $0x3e0] sm:$0xff]  ;;  %1602 = vst [vmem:[%s2287_s20 + $0x398] sm:$0xff] %v1346_v17  ;;  %v1348_v31 = vadd.f32 %v1092_v18, %v580_v14  ;;  %v1349_v32 = vadd.f32 %v1093_v20, %v581_v19  ;;  %v1095_v33 = vmul.f32 0.5, %v839_v15 }
  0xb8   : > { %v842_v29 = vld [vmem:[%s2257_s19 + $0x3d8] sm:$0xff]  ;;  %v584_v34 = vmul.f32 0.5, %v328_v16  ;;  %v843_v35 = vld [vmem:[%s2257_s19 + $0x3e0] sm:$0xff]  ;;  %v332_v36 = vld [vmem:[%s2265_s29 + $0x3e8] sm:$0xff]  ;;  %1603 = vst [vmem:[%s2287_s20 + $0x3a0] sm:$0xff] %v1347_v24  ;;  %v1350_v37 = vadd.f32 %v1094_v26, %v582_v25  ;;  %v1096_v38 = vmul.f32 0.5, %v840_v21 }
  0xb9   : > { %v585_v39 = vmul.f32 0.5, %v329_v22  ;;  %v1097_v40 = vmul.f32 0.5, %v841_v23  ;;  %v844_v41 = vld [vmem:[%s2257_s19 + $0x3e8] sm:$0xff]  ;;  %v333_v42 = vld [vmem:[%s2265_s29 + $0x3f0] sm:$0xff]  ;;  %1604 = vst [vmem:[%s2287_s20 + $0x3a8] sm:$0xff] %v1348_v31  ;;  %1605 = vst [vmem:[%s2287_s20 + $0x3b0] sm:$0xff] %v1349_v32  ;;  %v1351_v44 = vadd.f32 %v1095_v33, %v583_v27 }
  0xba   : > { %v845_v43 = vld [vmem:[%s2257_s19 + $0x3f0] sm:$0xff]  ;;  %v586_v45 = vmul.f32 0.5, %v330_v28  ;;  %v1098_v46 = vmul.f32 0.5, %v842_v29  ;;  %v587_v47 = vmul.f32 0.5, %v331_v30  ;;  %v334_v48 = vld [vmem:[%s2265_s29 + $0x3f8] sm:$0xff]  ;;  %v335_v50 = vld [vmem:[%s2265_s29 + $0x400] sm:$0xff]  ;;  %v1352_v51 = vadd.f32 %v1096_v38, %v584_v34 }
  0xbb   : > { %v846_v49 = vld [vmem:[%s2257_s19 + $0x3f8] sm:$0xff]  ;;  %1606 = vst [vmem:[%s2287_s20 + $0x3b8] sm:$0xff] %v1350_v37  ;;  %v1353_v52 = vadd.f32 %v1097_v40, %v585_v39  ;;  %v1099_v53 = vmul.f32 0.5, %v843_v35  ;;  %v588_v54 = vmul.f32 0.5, %v332_v36  ;;  %v847_v55 = vld [vmem:[%s2257_s19 + $0x400] sm:$0xff]  ;;  %v336_v56 = vld [vmem:[%s2265_s29 + $0x408] sm:$0xff] }
  0xbc   : > { %1607 = vst [vmem:[%s2287_s20 + $0x3c0] sm:$0xff] %v1351_v44  ;;  %v1354_v57 = vadd.f32 %v1098_v46, %v586_v45  ;;  %v1100_v58 = vmul.f32 0.5, %v844_v41  ;;  %v589_v59 = vmul.f32 0.5, %v333_v42  ;;  %v1101_v60 = vmul.f32 0.5, %v845_v43  ;;  %v848_v61 = vld [vmem:[%s2257_s19 + $0x408] sm:$0xff]  ;;  %v337_v62 = vld [vmem:[%s2265_s29 + $0x410] sm:$0xff] }
  0xbd   : > { %v849_v63 = vld [vmem:[%s2257_s19 + $0x410] sm:$0xff]  ;;  %1608 = vst [vmem:[%s2287_s20 + $0x3c8] sm:$0xff] %v1352_v51  ;;  %1609 = vst [vmem:[%s2287_s20 + $0x3d0] sm:$0xff] %v1353_v52  ;;  %v1355_v0 = vadd.f32 %v1099_v53, %v587_v47  ;;  %v590_v1 = vmul.f32 0.5, %v334_v48  ;;  %v1102_v2 = vmul.f32 0.5, %v846_v49  ;;  %v591_v3 = vmul.f32 0.5, %v335_v50 }
  0xbe   : > { %v338_v4 = vld [vmem:[%s2265_s29 + $0x418] sm:$0xff]  ;;  %v339_v6 = vld [vmem:[%s2265_s29 + $0x420] sm:$0xff]  ;;  %1610 = vst [vmem:[%s2287_s20 + $0x3d8] sm:$0xff] %v1354_v57  ;;  %v1356_v7 = vadd.f32 %v1100_v58, %v588_v54  ;;  %v1357_v8 = vadd.f32 %v1101_v60, %v589_v59  ;;  %v1103_v9 = vmul.f32 0.5, %v847_v55  ;;  %v592_v10 = vmul.f32 0.5, %v336_v56  ;;  %v340_v12 = vld [vmem:[%s2265_s29 + $0x428] sm:$0xff] }
  0xbf   : > { %v850_v5 = vld [vmem:[%s2257_s19 + $0x418] sm:$0xff]  ;;  %v851_v11 = vld [vmem:[%s2257_s19 + $0x420] sm:$0xff]  ;;  %1611 = vst [vmem:[%s2287_s20 + $0x3e0] sm:$0xff] %v1355_v0  ;;  %v1358_v13 = vadd.f32 %v1102_v2, %v590_v1  ;;  %v1104_v14 = vmul.f32 0.5, %v848_v61  ;;  %v593_v15 = vmul.f32 0.5, %v337_v62  ;;  %v1105_v16 = vmul.f32 0.5, %v849_v63 }
  0xc0   : > { %v852_v17 = vld [vmem:[%s2257_s19 + $0x428] sm:$0xff]  ;;  %v341_v18 = vld [vmem:[%s2265_s29 + $0x430] sm:$0xff]  ;;  %1612 = vst [vmem:[%s2287_s20 + $0x3e8] sm:$0xff] %v1356_v7  ;;  %1613 = vst [vmem:[%s2287_s20 + $0x3f0] sm:$0xff] %v1357_v8  ;;  %v1359_v20 = vadd.f32 %v1103_v9, %v591_v3  ;;  %v594_v21 = vmul.f32 0.5, %v338_v4  ;;  %v1106_v22 = vmul.f32 0.5, %v850_v5 }
  0xc1   : > { %v853_v19 = vld [vmem:[%s2257_s19 + $0x430] sm:$0xff]  ;;  %v595_v23 = vmul.f32 0.5, %v339_v6  ;;  %v342_v24 = vld [vmem:[%s2265_s29 + $0x438] sm:$0xff]  ;;  %v343_v26 = vld [vmem:[%s2265_s29 + $0x440] sm:$0xff]  ;;  %1614 = vst [vmem:[%s2287_s20 + $0x3f8] sm:$0xff] %v1358_v13  ;;  %v1360_v27 = vadd.f32 %v1104_v14, %v592_v10  ;;  %v1361_v28 = vadd.f32 %v1105_v16, %v593_v15  ;;  %v1107_v29 = vmul.f32 0.5, %v851_v11 }
  0xc2   : > { %v854_v25 = vld [vmem:[%s2257_s19 + $0x438] sm:$0xff]  ;;  %v596_v30 = vmul.f32 0.5, %v340_v12  ;;  %v855_v31 = vld [vmem:[%s2257_s19 + $0x440] sm:$0xff]  ;;  %v344_v32 = vld [vmem:[%s2265_s29 + $0x448] sm:$0xff]  ;;  %1615 = vst [vmem:[%s2287_s20 + $0x400] sm:$0xff] %v1359_v20  ;;  %v1362_v33 = vadd.f32 %v1106_v22, %v594_v21  ;;  %v1108_v34 = vmul.f32 0.5, %v852_v17 }
  0xc3   : > { %v597_v35 = vmul.f32 0.5, %v341_v18  ;;  %v1109_v36 = vmul.f32 0.5, %v853_v19  ;;  %v856_v37 = vld [vmem:[%s2257_s19 + $0x448] sm:$0xff]  ;;  %v345_v38 = vld [vmem:[%s2265_s29 + $0x450] sm:$0xff]  ;;  %1616 = vst [vmem:[%s2287_s20 + $0x408] sm:$0xff] %v1360_v27  ;;  %1617 = vst [vmem:[%s2287_s20 + $0x410] sm:$0xff] %v1361_v28  ;;  %v1363_v40 = vadd.f32 %v1107_v29, %v595_v23 }
  0xc4   : > { %v857_v39 = vld [vmem:[%s2257_s19 + $0x450] sm:$0xff]  ;;  %v598_v41 = vmul.f32 0.5, %v342_v24  ;;  %v1110_v42 = vmul.f32 0.5, %v854_v25  ;;  %v599_v43 = vmul.f32 0.5, %v343_v26  ;;  %v346_v44 = vld [vmem:[%s2265_s29 + $0x458] sm:$0xff]  ;;  %v347_v46 = vld [vmem:[%s2265_s29 + $0x460] sm:$0xff]  ;;  %v1364_v47 = vadd.f32 %v1108_v34, %v596_v30 }
  0xc5   : > { %v858_v45 = vld [vmem:[%s2257_s19 + $0x458] sm:$0xff]  ;;  %1618 = vst [vmem:[%s2287_s20 + $0x418] sm:$0xff] %v1362_v33  ;;  %v1365_v48 = vadd.f32 %v1109_v36, %v597_v35  ;;  %v1111_v49 = vmul.f32 0.5, %v855_v31  ;;  %v600_v50 = vmul.f32 0.5, %v344_v32  ;;  %v859_v51 = vld [vmem:[%s2257_s19 + $0x460] sm:$0xff]  ;;  %v348_v52 = vld [vmem:[%s2265_s29 + $0x468] sm:$0xff] }
  0xc6   : > { %1619 = vst [vmem:[%s2287_s20 + $0x420] sm:$0xff] %v1363_v40  ;;  %v1366_v53 = vadd.f32 %v1110_v42, %v598_v41  ;;  %v1112_v54 = vmul.f32 0.5, %v856_v37  ;;  %v601_v55 = vmul.f32 0.5, %v345_v38  ;;  %v1113_v56 = vmul.f32 0.5, %v857_v39  ;;  %v860_v57 = vld [vmem:[%s2257_s19 + $0x468] sm:$0xff]  ;;  %v349_v58 = vld [vmem:[%s2265_s29 + $0x470] sm:$0xff] }
  0xc7   : > { %v861_v59 = vld [vmem:[%s2257_s19 + $0x470] sm:$0xff]  ;;  %1620 = vst [vmem:[%s2287_s20 + $0x428] sm:$0xff] %v1364_v47  ;;  %1621 = vst [vmem:[%s2287_s20 + $0x430] sm:$0xff] %v1365_v48  ;;  %v1367_v60 = vadd.f32 %v1111_v49, %v599_v43  ;;  %v602_v61 = vmul.f32 0.5, %v346_v44  ;;  %v1114_v62 = vmul.f32 0.5, %v858_v45  ;;  %v603_v63 = vmul.f32 0.5, %v347_v46 }
  0xc8   : > { %v350_v0 = vld [vmem:[%s2265_s29 + $0x478] sm:$0xff]  ;;  %v351_v2 = vld [vmem:[%s2265_s29 + $0x480] sm:$0xff]  ;;  %1622 = vst [vmem:[%s2287_s20 + $0x438] sm:$0xff] %v1366_v53  ;;  %v1368_v3 = vadd.f32 %v1112_v54, %v600_v50  ;;  %v1369_v4 = vadd.f32 %v1113_v56, %v601_v55  ;;  %v1115_v5 = vmul.f32 0.5, %v859_v51  ;;  %v604_v6 = vmul.f32 0.5, %v348_v52  ;;  %v352_v8 = vld [vmem:[%s2265_s29 + $0x488] sm:$0xff] }
  0xc9   : > { %v862_v1 = vld [vmem:[%s2257_s19 + $0x478] sm:$0xff]  ;;  %v863_v7 = vld [vmem:[%s2257_s19 + $0x480] sm:$0xff]  ;;  %1623 = vst [vmem:[%s2287_s20 + $0x440] sm:$0xff] %v1367_v60  ;;  %v1370_v9 = vadd.f32 %v1114_v62, %v602_v61  ;;  %v1116_v10 = vmul.f32 0.5, %v860_v57  ;;  %v605_v11 = vmul.f32 0.5, %v349_v58  ;;  %v1117_v12 = vmul.f32 0.5, %v861_v59 }
  0xca   : > { %v864_v13 = vld [vmem:[%s2257_s19 + $0x488] sm:$0xff]  ;;  %v353_v14 = vld [vmem:[%s2265_s29 + $0x490] sm:$0xff]  ;;  %1624 = vst [vmem:[%s2287_s20 + $0x448] sm:$0xff] %v1368_v3  ;;  %1625 = vst [vmem:[%s2287_s20 + $0x450] sm:$0xff] %v1369_v4  ;;  %v1371_v16 = vadd.f32 %v1115_v5, %v603_v63  ;;  %v606_v17 = vmul.f32 0.5, %v350_v0  ;;  %v1118_v18 = vmul.f32 0.5, %v862_v1 }
  0xcb   : > { %v865_v15 = vld [vmem:[%s2257_s19 + $0x490] sm:$0xff]  ;;  %v607_v19 = vmul.f32 0.5, %v351_v2  ;;  %v354_v20 = vld [vmem:[%s2265_s29 + $0x498] sm:$0xff]  ;;  %v355_v22 = vld [vmem:[%s2265_s29 + $0x4a0] sm:$0xff]  ;;  %1626 = vst [vmem:[%s2287_s20 + $0x458] sm:$0xff] %v1370_v9  ;;  %v1372_v23 = vadd.f32 %v1116_v10, %v604_v6  ;;  %v1373_v24 = vadd.f32 %v1117_v12, %v605_v11  ;;  %v1119_v25 = vmul.f32 0.5, %v863_v7 }
  0xcc   : > { %v866_v21 = vld [vmem:[%s2257_s19 + $0x498] sm:$0xff]  ;;  %v608_v26 = vmul.f32 0.5, %v352_v8  ;;  %v867_v27 = vld [vmem:[%s2257_s19 + $0x4a0] sm:$0xff]  ;;  %v356_v28 = vld [vmem:[%s2265_s29 + $0x4a8] sm:$0xff]  ;;  %1627 = vst [vmem:[%s2287_s20 + $0x460] sm:$0xff] %v1371_v16  ;;  %v1374_v29 = vadd.f32 %v1118_v18, %v606_v17  ;;  %v1120_v30 = vmul.f32 0.5, %v864_v13 }
  0xcd   : > { %v609_v31 = vmul.f32 0.5, %v353_v14  ;;  %v1121_v32 = vmul.f32 0.5, %v865_v15  ;;  %v868_v33 = vld [vmem:[%s2257_s19 + $0x4a8] sm:$0xff]  ;;  %v357_v34 = vld [vmem:[%s2265_s29 + $0x4b0] sm:$0xff]  ;;  %1628 = vst [vmem:[%s2287_s20 + $0x468] sm:$0xff] %v1372_v23  ;;  %1629 = vst [vmem:[%s2287_s20 + $0x470] sm:$0xff] %v1373_v24  ;;  %v1375_v36 = vadd.f32 %v1119_v25, %v607_v19 }
  0xce   : > { %v869_v35 = vld [vmem:[%s2257_s19 + $0x4b0] sm:$0xff]  ;;  %v610_v37 = vmul.f32 0.5, %v354_v20  ;;  %v1122_v38 = vmul.f32 0.5, %v866_v21  ;;  %v611_v39 = vmul.f32 0.5, %v355_v22  ;;  %v358_v40 = vld [vmem:[%s2265_s29 + $0x4b8] sm:$0xff]  ;;  %v359_v42 = vld [vmem:[%s2265_s29 + $0x4c0] sm:$0xff]  ;;  %v1376_v43 = vadd.f32 %v1120_v30, %v608_v26 }
  0xcf   : > { %v870_v41 = vld [vmem:[%s2257_s19 + $0x4b8] sm:$0xff]  ;;  %1630 = vst [vmem:[%s2287_s20 + $0x478] sm:$0xff] %v1374_v29  ;;  %v1377_v44 = vadd.f32 %v1121_v32, %v609_v31  ;;  %v1123_v45 = vmul.f32 0.5, %v867_v27  ;;  %v612_v46 = vmul.f32 0.5, %v356_v28  ;;  %v871_v47 = vld [vmem:[%s2257_s19 + $0x4c0] sm:$0xff]  ;;  %v360_v48 = vld [vmem:[%s2265_s29 + $0x4c8] sm:$0xff] }
  0xd0   : > { %1631 = vst [vmem:[%s2287_s20 + $0x480] sm:$0xff] %v1375_v36  ;;  %v1378_v49 = vadd.f32 %v1122_v38, %v610_v37  ;;  %v1124_v50 = vmul.f32 0.5, %v868_v33  ;;  %v613_v51 = vmul.f32 0.5, %v357_v34  ;;  %v1125_v52 = vmul.f32 0.5, %v869_v35  ;;  %v872_v53 = vld [vmem:[%s2257_s19 + $0x4c8] sm:$0xff]  ;;  %v361_v54 = vld [vmem:[%s2265_s29 + $0x4d0] sm:$0xff] }
  0xd1   : > { %v873_v55 = vld [vmem:[%s2257_s19 + $0x4d0] sm:$0xff]  ;;  %1632 = vst [vmem:[%s2287_s20 + $0x488] sm:$0xff] %v1376_v43  ;;  %1633 = vst [vmem:[%s2287_s20 + $0x490] sm:$0xff] %v1377_v44  ;;  %v1379_v56 = vadd.f32 %v1123_v45, %v611_v39  ;;  %v614_v57 = vmul.f32 0.5, %v358_v40  ;;  %v1126_v58 = vmul.f32 0.5, %v870_v41  ;;  %v615_v59 = vmul.f32 0.5, %v359_v42 }
  0xd2   : > { %v362_v60 = vld [vmem:[%s2265_s29 + $0x4d8] sm:$0xff]  ;;  %v363_v62 = vld [vmem:[%s2265_s29 + $0x4e0] sm:$0xff]  ;;  %1634 = vst [vmem:[%s2287_s20 + $0x498] sm:$0xff] %v1378_v49  ;;  %v1380_v63 = vadd.f32 %v1124_v50, %v612_v46  ;;  %v1381_v0 = vadd.f32 %v1125_v52, %v613_v51  ;;  %v1127_v1 = vmul.f32 0.5, %v871_v47  ;;  %v616_v2 = vmul.f32 0.5, %v360_v48  ;;  %v364_v4 = vld [vmem:[%s2265_s29 + $0x4e8] sm:$0xff] }
  0xd3   : > { %v874_v61 = vld [vmem:[%s2257_s19 + $0x4d8] sm:$0xff]  ;;  %v875_v3 = vld [vmem:[%s2257_s19 + $0x4e0] sm:$0xff]  ;;  %1635 = vst [vmem:[%s2287_s20 + $0x4a0] sm:$0xff] %v1379_v56  ;;  %v1382_v5 = vadd.f32 %v1126_v58, %v614_v57  ;;  %v1128_v6 = vmul.f32 0.5, %v872_v53  ;;  %v617_v7 = vmul.f32 0.5, %v361_v54  ;;  %v1129_v8 = vmul.f32 0.5, %v873_v55 }
  0xd4   : > { %v876_v9 = vld [vmem:[%s2257_s19 + $0x4e8] sm:$0xff]  ;;  %v365_v10 = vld [vmem:[%s2265_s29 + $0x4f0] sm:$0xff]  ;;  %1636 = vst [vmem:[%s2287_s20 + $0x4a8] sm:$0xff] %v1380_v63  ;;  %1637 = vst [vmem:[%s2287_s20 + $0x4b0] sm:$0xff] %v1381_v0  ;;  %v1383_v12 = vadd.f32 %v1127_v1, %v615_v59  ;;  %v618_v13 = vmul.f32 0.5, %v362_v60  ;;  %v1130_v14 = vmul.f32 0.5, %v874_v61 }
  0xd5   : > { %v877_v11 = vld [vmem:[%s2257_s19 + $0x4f0] sm:$0xff]  ;;  %v619_v15 = vmul.f32 0.5, %v363_v62  ;;  %v366_v16 = vld [vmem:[%s2265_s29 + $0x4f8] sm:$0xff]  ;;  %v367_v18 = vld [vmem:[%s2265_s29 + $0x500] sm:$0xff]  ;;  %1638 = vst [vmem:[%s2287_s20 + $0x4b8] sm:$0xff] %v1382_v5  ;;  %v1384_v19 = vadd.f32 %v1128_v6, %v616_v2  ;;  %v1385_v20 = vadd.f32 %v1129_v8, %v617_v7  ;;  %v1131_v21 = vmul.f32 0.5, %v875_v3 }
  0xd6   : > { %v878_v17 = vld [vmem:[%s2257_s19 + $0x4f8] sm:$0xff]  ;;  %v620_v22 = vmul.f32 0.5, %v364_v4  ;;  %v879_v23 = vld [vmem:[%s2257_s19 + $0x500] sm:$0xff]  ;;  %v368_v24 = vld [vmem:[%s2265_s29 + $0x508] sm:$0xff]  ;;  %1639 = vst [vmem:[%s2287_s20 + $0x4c0] sm:$0xff] %v1383_v12  ;;  %v1386_v25 = vadd.f32 %v1130_v14, %v618_v13  ;;  %v1132_v26 = vmul.f32 0.5, %v876_v9 }
  0xd7   : > { %v621_v27 = vmul.f32 0.5, %v365_v10  ;;  %v1133_v28 = vmul.f32 0.5, %v877_v11  ;;  %v880_v29 = vld [vmem:[%s2257_s19 + $0x508] sm:$0xff]  ;;  %v369_v30 = vld [vmem:[%s2265_s29 + $0x510] sm:$0xff]  ;;  %1640 = vst [vmem:[%s2287_s20 + $0x4c8] sm:$0xff] %v1384_v19  ;;  %1641 = vst [vmem:[%s2287_s20 + $0x4d0] sm:$0xff] %v1385_v20  ;;  %v1387_v32 = vadd.f32 %v1131_v21, %v619_v15 }
  0xd8   : > { %v881_v31 = vld [vmem:[%s2257_s19 + $0x510] sm:$0xff]  ;;  %v622_v33 = vmul.f32 0.5, %v366_v16  ;;  %v1134_v34 = vmul.f32 0.5, %v878_v17  ;;  %v623_v35 = vmul.f32 0.5, %v367_v18  ;;  %v370_v36 = vld [vmem:[%s2265_s29 + $0x518] sm:$0xff]  ;;  %v371_v38 = vld [vmem:[%s2265_s29 + $0x520] sm:$0xff]  ;;  %v1388_v39 = vadd.f32 %v1132_v26, %v620_v22 }
  0xd9   : > { %v882_v37 = vld [vmem:[%s2257_s19 + $0x518] sm:$0xff]  ;;  %1642 = vst [vmem:[%s2287_s20 + $0x4d8] sm:$0xff] %v1386_v25  ;;  %v1389_v40 = vadd.f32 %v1133_v28, %v621_v27  ;;  %v1135_v41 = vmul.f32 0.5, %v879_v23  ;;  %v624_v42 = vmul.f32 0.5, %v368_v24  ;;  %v883_v43 = vld [vmem:[%s2257_s19 + $0x520] sm:$0xff]  ;;  %v372_v44 = vld [vmem:[%s2265_s29 + $0x528] sm:$0xff] }
  0xda   : > { %1643 = vst [vmem:[%s2287_s20 + $0x4e0] sm:$0xff] %v1387_v32  ;;  %v1390_v45 = vadd.f32 %v1134_v34, %v622_v33  ;;  %v1136_v46 = vmul.f32 0.5, %v880_v29  ;;  %v625_v47 = vmul.f32 0.5, %v369_v30  ;;  %v1137_v48 = vmul.f32 0.5, %v881_v31  ;;  %v884_v49 = vld [vmem:[%s2257_s19 + $0x528] sm:$0xff]  ;;  %v373_v50 = vld [vmem:[%s2265_s29 + $0x530] sm:$0xff] }
  0xdb   : > { %v885_v51 = vld [vmem:[%s2257_s19 + $0x530] sm:$0xff]  ;;  %1644 = vst [vmem:[%s2287_s20 + $0x4e8] sm:$0xff] %v1388_v39  ;;  %1645 = vst [vmem:[%s2287_s20 + $0x4f0] sm:$0xff] %v1389_v40  ;;  %v1391_v52 = vadd.f32 %v1135_v41, %v623_v35  ;;  %v626_v53 = vmul.f32 0.5, %v370_v36  ;;  %v1138_v54 = vmul.f32 0.5, %v882_v37  ;;  %v627_v55 = vmul.f32 0.5, %v371_v38 }
  0xdc   : > { %v374_v56 = vld [vmem:[%s2265_s29 + $0x538] sm:$0xff]  ;;  %v375_v58 = vld [vmem:[%s2265_s29 + $0x540] sm:$0xff]  ;;  %1646 = vst [vmem:[%s2287_s20 + $0x4f8] sm:$0xff] %v1390_v45  ;;  %v1392_v59 = vadd.f32 %v1136_v46, %v624_v42  ;;  %v1393_v60 = vadd.f32 %v1137_v48, %v625_v47  ;;  %v1139_v61 = vmul.f32 0.5, %v883_v43  ;;  %v628_v62 = vmul.f32 0.5, %v372_v44  ;;  %v376_v0 = vld [vmem:[%s2265_s29 + $0x548] sm:$0xff] }
  0xdd   : > { %v886_v57 = vld [vmem:[%s2257_s19 + $0x538] sm:$0xff]  ;;  %v887_v63 = vld [vmem:[%s2257_s19 + $0x540] sm:$0xff]  ;;  %1647 = vst [vmem:[%s2287_s20 + $0x500] sm:$0xff] %v1391_v52  ;;  %v1394_v1 = vadd.f32 %v1138_v54, %v626_v53  ;;  %v1140_v2 = vmul.f32 0.5, %v884_v49  ;;  %v629_v3 = vmul.f32 0.5, %v373_v50  ;;  %v1141_v4 = vmul.f32 0.5, %v885_v51 }
  0xde   : > { %v888_v5 = vld [vmem:[%s2257_s19 + $0x548] sm:$0xff]  ;;  %v377_v6 = vld [vmem:[%s2265_s29 + $0x550] sm:$0xff]  ;;  %1648 = vst [vmem:[%s2287_s20 + $0x508] sm:$0xff] %v1392_v59  ;;  %1649 = vst [vmem:[%s2287_s20 + $0x510] sm:$0xff] %v1393_v60  ;;  %v1395_v8 = vadd.f32 %v1139_v61, %v627_v55  ;;  %v630_v9 = vmul.f32 0.5, %v374_v56  ;;  %v1142_v10 = vmul.f32 0.5, %v886_v57 }
  0xdf   : > { %v889_v7 = vld [vmem:[%s2257_s19 + $0x550] sm:$0xff]  ;;  %v631_v11 = vmul.f32 0.5, %v375_v58  ;;  %v378_v12 = vld [vmem:[%s2265_s29 + $0x558] sm:$0xff]  ;;  %v379_v14 = vld [vmem:[%s2265_s29 + $0x560] sm:$0xff]  ;;  %1650 = vst [vmem:[%s2287_s20 + $0x518] sm:$0xff] %v1394_v1  ;;  %v1396_v15 = vadd.f32 %v1140_v2, %v628_v62  ;;  %v1397_v16 = vadd.f32 %v1141_v4, %v629_v3  ;;  %v1143_v17 = vmul.f32 0.5, %v887_v63 }
  0xe0   : > { %v890_v13 = vld [vmem:[%s2257_s19 + $0x558] sm:$0xff]  ;;  %v632_v18 = vmul.f32 0.5, %v376_v0  ;;  %v891_v19 = vld [vmem:[%s2257_s19 + $0x560] sm:$0xff]  ;;  %v380_v20 = vld [vmem:[%s2265_s29 + $0x568] sm:$0xff]  ;;  %1651 = vst [vmem:[%s2287_s20 + $0x520] sm:$0xff] %v1395_v8  ;;  %v1398_v21 = vadd.f32 %v1142_v10, %v630_v9  ;;  %v1144_v22 = vmul.f32 0.5, %v888_v5 }
  0xe1   : > { %v633_v23 = vmul.f32 0.5, %v377_v6  ;;  %v1145_v24 = vmul.f32 0.5, %v889_v7  ;;  %v892_v25 = vld [vmem:[%s2257_s19 + $0x568] sm:$0xff]  ;;  %v381_v26 = vld [vmem:[%s2265_s29 + $0x570] sm:$0xff]  ;;  %1652 = vst [vmem:[%s2287_s20 + $0x528] sm:$0xff] %v1396_v15  ;;  %1653 = vst [vmem:[%s2287_s20 + $0x530] sm:$0xff] %v1397_v16  ;;  %v1399_v28 = vadd.f32 %v1143_v17, %v631_v11 }
  0xe2   : > { %v893_v27 = vld [vmem:[%s2257_s19 + $0x570] sm:$0xff]  ;;  %v634_v29 = vmul.f32 0.5, %v378_v12  ;;  %v1146_v30 = vmul.f32 0.5, %v890_v13  ;;  %v635_v31 = vmul.f32 0.5, %v379_v14  ;;  %v382_v32 = vld [vmem:[%s2265_s29 + $0x578] sm:$0xff]  ;;  %v383_v34 = vld [vmem:[%s2265_s29 + $0x580] sm:$0xff]  ;;  %v1400_v35 = vadd.f32 %v1144_v22, %v632_v18 }
  0xe3   : > { %v894_v33 = vld [vmem:[%s2257_s19 + $0x578] sm:$0xff]  ;;  %1654 = vst [vmem:[%s2287_s20 + $0x538] sm:$0xff] %v1398_v21  ;;  %v1401_v36 = vadd.f32 %v1145_v24, %v633_v23  ;;  %v1147_v37 = vmul.f32 0.5, %v891_v19  ;;  %v636_v38 = vmul.f32 0.5, %v380_v20  ;;  %v895_v39 = vld [vmem:[%s2257_s19 + $0x580] sm:$0xff]  ;;  %v384_v40 = vld [vmem:[%s2265_s29 + $0x588] sm:$0xff] }
  0xe4   : > { %1655 = vst [vmem:[%s2287_s20 + $0x540] sm:$0xff] %v1399_v28  ;;  %v1402_v41 = vadd.f32 %v1146_v30, %v634_v29  ;;  %v1148_v42 = vmul.f32 0.5, %v892_v25  ;;  %v637_v43 = vmul.f32 0.5, %v381_v26  ;;  %v1149_v44 = vmul.f32 0.5, %v893_v27  ;;  %v896_v45 = vld [vmem:[%s2257_s19 + $0x588] sm:$0xff]  ;;  %v385_v46 = vld [vmem:[%s2265_s29 + $0x590] sm:$0xff] }
  0xe5   : > { %v897_v47 = vld [vmem:[%s2257_s19 + $0x590] sm:$0xff]  ;;  %1656 = vst [vmem:[%s2287_s20 + $0x548] sm:$0xff] %v1400_v35  ;;  %1657 = vst [vmem:[%s2287_s20 + $0x550] sm:$0xff] %v1401_v36  ;;  %v1403_v48 = vadd.f32 %v1147_v37, %v635_v31  ;;  %v638_v49 = vmul.f32 0.5, %v382_v32  ;;  %v1150_v50 = vmul.f32 0.5, %v894_v33  ;;  %v639_v51 = vmul.f32 0.5, %v383_v34 }
  0xe6   : > { %v386_v52 = vld [vmem:[%s2265_s29 + $0x598] sm:$0xff]  ;;  %v387_v54 = vld [vmem:[%s2265_s29 + $0x5a0] sm:$0xff]  ;;  %1658 = vst [vmem:[%s2287_s20 + $0x558] sm:$0xff] %v1402_v41  ;;  %v1404_v55 = vadd.f32 %v1148_v42, %v636_v38  ;;  %v1405_v56 = vadd.f32 %v1149_v44, %v637_v43  ;;  %v1151_v57 = vmul.f32 0.5, %v895_v39  ;;  %v640_v58 = vmul.f32 0.5, %v384_v40  ;;  %v388_v60 = vld [vmem:[%s2265_s29 + $0x5a8] sm:$0xff] }
  0xe7   : > { %v898_v53 = vld [vmem:[%s2257_s19 + $0x598] sm:$0xff]  ;;  %v899_v59 = vld [vmem:[%s2257_s19 + $0x5a0] sm:$0xff]  ;;  %1659 = vst [vmem:[%s2287_s20 + $0x560] sm:$0xff] %v1403_v48  ;;  %v1406_v61 = vadd.f32 %v1150_v50, %v638_v49  ;;  %v1152_v62 = vmul.f32 0.5, %v896_v45  ;;  %v641_v63 = vmul.f32 0.5, %v385_v46  ;;  %v1153_v0 = vmul.f32 0.5, %v897_v47 }
  0xe8   : > { %v900_v1 = vld [vmem:[%s2257_s19 + $0x5a8] sm:$0xff]  ;;  %v389_v2 = vld [vmem:[%s2265_s29 + $0x5b0] sm:$0xff]  ;;  %1660 = vst [vmem:[%s2287_s20 + $0x568] sm:$0xff] %v1404_v55  ;;  %1661 = vst [vmem:[%s2287_s20 + $0x570] sm:$0xff] %v1405_v56  ;;  %v1407_v4 = vadd.f32 %v1151_v57, %v639_v51  ;;  %v642_v5 = vmul.f32 0.5, %v386_v52  ;;  %v1154_v6 = vmul.f32 0.5, %v898_v53 }
  0xe9   : > { %v901_v3 = vld [vmem:[%s2257_s19 + $0x5b0] sm:$0xff]  ;;  %v643_v7 = vmul.f32 0.5, %v387_v54  ;;  %v390_v8 = vld [vmem:[%s2265_s29 + $0x5b8] sm:$0xff]  ;;  %v391_v10 = vld [vmem:[%s2265_s29 + $0x5c0] sm:$0xff]  ;;  %1662 = vst [vmem:[%s2287_s20 + $0x578] sm:$0xff] %v1406_v61  ;;  %v1408_v11 = vadd.f32 %v1152_v62, %v640_v58  ;;  %v1409_v12 = vadd.f32 %v1153_v0, %v641_v63  ;;  %v1155_v13 = vmul.f32 0.5, %v899_v59 }
  0xea   : > { %v902_v9 = vld [vmem:[%s2257_s19 + $0x5b8] sm:$0xff]  ;;  %v644_v14 = vmul.f32 0.5, %v388_v60  ;;  %v903_v15 = vld [vmem:[%s2257_s19 + $0x5c0] sm:$0xff]  ;;  %v392_v16 = vld [vmem:[%s2265_s29 + $0x5c8] sm:$0xff]  ;;  %1663 = vst [vmem:[%s2287_s20 + $0x580] sm:$0xff] %v1407_v4  ;;  %v1410_v17 = vadd.f32 %v1154_v6, %v642_v5  ;;  %v1156_v18 = vmul.f32 0.5, %v900_v1 }
  0xeb   : > { %v645_v19 = vmul.f32 0.5, %v389_v2  ;;  %v1157_v20 = vmul.f32 0.5, %v901_v3  ;;  %v904_v21 = vld [vmem:[%s2257_s19 + $0x5c8] sm:$0xff]  ;;  %v393_v22 = vld [vmem:[%s2265_s29 + $0x5d0] sm:$0xff]  ;;  %1664 = vst [vmem:[%s2287_s20 + $0x588] sm:$0xff] %v1408_v11  ;;  %1665 = vst [vmem:[%s2287_s20 + $0x590] sm:$0xff] %v1409_v12  ;;  %v1411_v24 = vadd.f32 %v1155_v13, %v643_v7 }
  0xec   : > { %v905_v23 = vld [vmem:[%s2257_s19 + $0x5d0] sm:$0xff]  ;;  %v646_v25 = vmul.f32 0.5, %v390_v8  ;;  %v1158_v26 = vmul.f32 0.5, %v902_v9  ;;  %v647_v27 = vmul.f32 0.5, %v391_v10  ;;  %v394_v28 = vld [vmem:[%s2265_s29 + $0x5d8] sm:$0xff]  ;;  %v395_v30 = vld [vmem:[%s2265_s29 + $0x5e0] sm:$0xff]  ;;  %v1412_v31 = vadd.f32 %v1156_v18, %v644_v14 }
  0xed   : > { %v906_v29 = vld [vmem:[%s2257_s19 + $0x5d8] sm:$0xff]  ;;  %1666 = vst [vmem:[%s2287_s20 + $0x598] sm:$0xff] %v1410_v17  ;;  %v1413_v32 = vadd.f32 %v1157_v20, %v645_v19  ;;  %v1159_v33 = vmul.f32 0.5, %v903_v15  ;;  %v648_v34 = vmul.f32 0.5, %v392_v16  ;;  %v907_v35 = vld [vmem:[%s2257_s19 + $0x5e0] sm:$0xff]  ;;  %v396_v36 = vld [vmem:[%s2265_s29 + $0x5e8] sm:$0xff] }
  0xee   : > { %1667 = vst [vmem:[%s2287_s20 + $0x5a0] sm:$0xff] %v1411_v24  ;;  %v1414_v37 = vadd.f32 %v1158_v26, %v646_v25  ;;  %v1160_v38 = vmul.f32 0.5, %v904_v21  ;;  %v649_v39 = vmul.f32 0.5, %v393_v22  ;;  %v1161_v40 = vmul.f32 0.5, %v905_v23  ;;  %v908_v41 = vld [vmem:[%s2257_s19 + $0x5e8] sm:$0xff]  ;;  %v397_v42 = vld [vmem:[%s2265_s29 + $0x5f0] sm:$0xff] }
  0xef   : > { %v909_v43 = vld [vmem:[%s2257_s19 + $0x5f0] sm:$0xff]  ;;  %1668 = vst [vmem:[%s2287_s20 + $0x5a8] sm:$0xff] %v1412_v31  ;;  %1669 = vst [vmem:[%s2287_s20 + $0x5b0] sm:$0xff] %v1413_v32  ;;  %v1415_v44 = vadd.f32 %v1159_v33, %v647_v27  ;;  %v650_v45 = vmul.f32 0.5, %v394_v28  ;;  %v1162_v46 = vmul.f32 0.5, %v906_v29  ;;  %v651_v47 = vmul.f32 0.5, %v395_v30 }
  0xf0   : > { %v398_v48 = vld [vmem:[%s2265_s29 + $0x5f8] sm:$0xff]  ;;  %v399_v50 = vld [vmem:[%s2265_s29 + $0x600] sm:$0xff]  ;;  %1670 = vst [vmem:[%s2287_s20 + $0x5b8] sm:$0xff] %v1414_v37  ;;  %v1416_v51 = vadd.f32 %v1160_v38, %v648_v34  ;;  %v1417_v52 = vadd.f32 %v1161_v40, %v649_v39  ;;  %v1163_v53 = vmul.f32 0.5, %v907_v35  ;;  %v652_v54 = vmul.f32 0.5, %v396_v36  ;;  %v400_v56 = vld [vmem:[%s2265_s29 + $0x608] sm:$0xff] }
  0xf1   : > { %v910_v49 = vld [vmem:[%s2257_s19 + $0x5f8] sm:$0xff]  ;;  %v911_v55 = vld [vmem:[%s2257_s19 + $0x600] sm:$0xff]  ;;  %1671 = vst [vmem:[%s2287_s20 + $0x5c0] sm:$0xff] %v1415_v44  ;;  %v1418_v57 = vadd.f32 %v1162_v46, %v650_v45  ;;  %v1164_v58 = vmul.f32 0.5, %v908_v41  ;;  %v653_v59 = vmul.f32 0.5, %v397_v42  ;;  %v1165_v60 = vmul.f32 0.5, %v909_v43 }
  0xf2   : > { %v912_v61 = vld [vmem:[%s2257_s19 + $0x608] sm:$0xff]  ;;  %v401_v62 = vld [vmem:[%s2265_s29 + $0x610] sm:$0xff]  ;;  %1672 = vst [vmem:[%s2287_s20 + $0x5c8] sm:$0xff] %v1416_v51  ;;  %1673 = vst [vmem:[%s2287_s20 + $0x5d0] sm:$0xff] %v1417_v52  ;;  %v1419_v0 = vadd.f32 %v1163_v53, %v651_v47  ;;  %v654_v1 = vmul.f32 0.5, %v398_v48  ;;  %v1166_v2 = vmul.f32 0.5, %v910_v49 }
  0xf3   : > { %v913_v63 = vld [vmem:[%s2257_s19 + $0x610] sm:$0xff]  ;;  %v655_v3 = vmul.f32 0.5, %v399_v50  ;;  %v402_v4 = vld [vmem:[%s2265_s29 + $0x618] sm:$0xff]  ;;  %v403_v6 = vld [vmem:[%s2265_s29 + $0x620] sm:$0xff]  ;;  %1674 = vst [vmem:[%s2287_s20 + $0x5d8] sm:$0xff] %v1418_v57  ;;  %v1420_v7 = vadd.f32 %v1164_v58, %v652_v54  ;;  %v1421_v8 = vadd.f32 %v1165_v60, %v653_v59  ;;  %v1167_v9 = vmul.f32 0.5, %v911_v55 }
  0xf4   : > { %v914_v5 = vld [vmem:[%s2257_s19 + $0x618] sm:$0xff]  ;;  %v656_v10 = vmul.f32 0.5, %v400_v56  ;;  %v915_v11 = vld [vmem:[%s2257_s19 + $0x620] sm:$0xff]  ;;  %v404_v12 = vld [vmem:[%s2265_s29 + $0x628] sm:$0xff]  ;;  %1675 = vst [vmem:[%s2287_s20 + $0x5e0] sm:$0xff] %v1419_v0  ;;  %v1422_v13 = vadd.f32 %v1166_v2, %v654_v1  ;;  %v1168_v14 = vmul.f32 0.5, %v912_v61 }
  0xf5   : > { %v657_v15 = vmul.f32 0.5, %v401_v62  ;;  %v1169_v16 = vmul.f32 0.5, %v913_v63  ;;  %v916_v17 = vld [vmem:[%s2257_s19 + $0x628] sm:$0xff]  ;;  %v405_v18 = vld [vmem:[%s2265_s29 + $0x630] sm:$0xff]  ;;  %1676 = vst [vmem:[%s2287_s20 + $0x5e8] sm:$0xff] %v1420_v7  ;;  %1677 = vst [vmem:[%s2287_s20 + $0x5f0] sm:$0xff] %v1421_v8  ;;  %v1423_v20 = vadd.f32 %v1167_v9, %v655_v3 }
  0xf6   : > { %v917_v19 = vld [vmem:[%s2257_s19 + $0x630] sm:$0xff]  ;;  %v658_v21 = vmul.f32 0.5, %v402_v4  ;;  %v1170_v22 = vmul.f32 0.5, %v914_v5  ;;  %v659_v23 = vmul.f32 0.5, %v403_v6  ;;  %v406_v24 = vld [vmem:[%s2265_s29 + $0x638] sm:$0xff]  ;;  %v407_v26 = vld [vmem:[%s2265_s29 + $0x640] sm:$0xff]  ;;  %v1424_v27 = vadd.f32 %v1168_v14, %v656_v10 }
  0xf7   : > { %v918_v25 = vld [vmem:[%s2257_s19 + $0x638] sm:$0xff]  ;;  %1678 = vst [vmem:[%s2287_s20 + $0x5f8] sm:$0xff] %v1422_v13  ;;  %v1425_v28 = vadd.f32 %v1169_v16, %v657_v15  ;;  %v1171_v29 = vmul.f32 0.5, %v915_v11  ;;  %v660_v30 = vmul.f32 0.5, %v404_v12  ;;  %v919_v31 = vld [vmem:[%s2257_s19 + $0x640] sm:$0xff]  ;;  %v408_v32 = vld [vmem:[%s2265_s29 + $0x648] sm:$0xff] }
  0xf8   : > { %1679 = vst [vmem:[%s2287_s20 + $0x600] sm:$0xff] %v1423_v20  ;;  %v1426_v33 = vadd.f32 %v1170_v22, %v658_v21  ;;  %v1172_v34 = vmul.f32 0.5, %v916_v17  ;;  %v661_v35 = vmul.f32 0.5, %v405_v18  ;;  %v1173_v36 = vmul.f32 0.5, %v917_v19  ;;  %v920_v37 = vld [vmem:[%s2257_s19 + $0x648] sm:$0xff]  ;;  %v409_v38 = vld [vmem:[%s2265_s29 + $0x650] sm:$0xff] }
  0xf9   : > { %v921_v39 = vld [vmem:[%s2257_s19 + $0x650] sm:$0xff]  ;;  %1680 = vst [vmem:[%s2287_s20 + $0x608] sm:$0xff] %v1424_v27  ;;  %1681 = vst [vmem:[%s2287_s20 + $0x610] sm:$0xff] %v1425_v28  ;;  %v1427_v40 = vadd.f32 %v1171_v29, %v659_v23  ;;  %v662_v41 = vmul.f32 0.5, %v406_v24  ;;  %v1174_v42 = vmul.f32 0.5, %v918_v25  ;;  %v663_v43 = vmul.f32 0.5, %v407_v26 }
  0xfa   : > { %v410_v44 = vld [vmem:[%s2265_s29 + $0x658] sm:$0xff]  ;;  %v411_v46 = vld [vmem:[%s2265_s29 + $0x660] sm:$0xff]  ;;  %1682 = vst [vmem:[%s2287_s20 + $0x618] sm:$0xff] %v1426_v33  ;;  %v1428_v47 = vadd.f32 %v1172_v34, %v660_v30  ;;  %v1429_v48 = vadd.f32 %v1173_v36, %v661_v35  ;;  %v1175_v49 = vmul.f32 0.5, %v919_v31  ;;  %v664_v50 = vmul.f32 0.5, %v408_v32  ;;  %v412_v52 = vld [vmem:[%s2265_s29 + $0x668] sm:$0xff] }
  0xfb   : > { %v922_v45 = vld [vmem:[%s2257_s19 + $0x658] sm:$0xff]  ;;  %v923_v51 = vld [vmem:[%s2257_s19 + $0x660] sm:$0xff]  ;;  %1683 = vst [vmem:[%s2287_s20 + $0x620] sm:$0xff] %v1427_v40  ;;  %v1430_v53 = vadd.f32 %v1174_v42, %v662_v41  ;;  %v1176_v54 = vmul.f32 0.5, %v920_v37  ;;  %v665_v55 = vmul.f32 0.5, %v409_v38  ;;  %v1177_v56 = vmul.f32 0.5, %v921_v39 }
  0xfc   : > { %v924_v57 = vld [vmem:[%s2257_s19 + $0x668] sm:$0xff]  ;;  %v413_v58 = vld [vmem:[%s2265_s29 + $0x670] sm:$0xff]  ;;  %1684 = vst [vmem:[%s2287_s20 + $0x628] sm:$0xff] %v1428_v47  ;;  %1685 = vst [vmem:[%s2287_s20 + $0x630] sm:$0xff] %v1429_v48  ;;  %v1431_v60 = vadd.f32 %v1175_v49, %v663_v43  ;;  %v666_v61 = vmul.f32 0.5, %v410_v44  ;;  %v1178_v62 = vmul.f32 0.5, %v922_v45 }
  0xfd   : > { %v925_v59 = vld [vmem:[%s2257_s19 + $0x670] sm:$0xff]  ;;  %v667_v63 = vmul.f32 0.5, %v411_v46  ;;  %v414_v0 = vld [vmem:[%s2265_s29 + $0x678] sm:$0xff]  ;;  %v415_v2 = vld [vmem:[%s2265_s29 + $0x680] sm:$0xff]  ;;  %1686 = vst [vmem:[%s2287_s20 + $0x638] sm:$0xff] %v1430_v53  ;;  %v1432_v3 = vadd.f32 %v1176_v54, %v664_v50  ;;  %v1433_v4 = vadd.f32 %v1177_v56, %v665_v55  ;;  %v1179_v5 = vmul.f32 0.5, %v923_v51 }
  0xfe   : > { %v926_v1 = vld [vmem:[%s2257_s19 + $0x678] sm:$0xff]  ;;  %v668_v6 = vmul.f32 0.5, %v412_v52  ;;  %v927_v7 = vld [vmem:[%s2257_s19 + $0x680] sm:$0xff]  ;;  %v416_v8 = vld [vmem:[%s2265_s29 + $0x688] sm:$0xff]  ;;  %1687 = vst [vmem:[%s2287_s20 + $0x640] sm:$0xff] %v1431_v60  ;;  %v1434_v9 = vadd.f32 %v1178_v62, %v666_v61  ;;  %v1180_v10 = vmul.f32 0.5, %v924_v57 }
  0xff   : > { %v669_v11 = vmul.f32 0.5, %v413_v58  ;;  %v1181_v12 = vmul.f32 0.5, %v925_v59  ;;  %v928_v13 = vld [vmem:[%s2257_s19 + $0x688] sm:$0xff]  ;;  %v417_v14 = vld [vmem:[%s2265_s29 + $0x690] sm:$0xff]  ;;  %1688 = vst [vmem:[%s2287_s20 + $0x648] sm:$0xff] %v1432_v3  ;;  %1689 = vst [vmem:[%s2287_s20 + $0x650] sm:$0xff] %v1433_v4  ;;  %v1435_v16 = vadd.f32 %v1179_v5, %v667_v63 }
 0x100   : > { %v929_v15 = vld [vmem:[%s2257_s19 + $0x690] sm:$0xff]  ;;  %v670_v17 = vmul.f32 0.5, %v414_v0  ;;  %v1182_v18 = vmul.f32 0.5, %v926_v1  ;;  %v671_v19 = vmul.f32 0.5, %v415_v2  ;;  %v418_v20 = vld [vmem:[%s2265_s29 + $0x698] sm:$0xff]  ;;  %v419_v22 = vld [vmem:[%s2265_s29 + $0x6a0] sm:$0xff]  ;;  %v1436_v23 = vadd.f32 %v1180_v10, %v668_v6 }
 0x101   : > { %v930_v21 = vld [vmem:[%s2257_s19 + $0x698] sm:$0xff]  ;;  %1690 = vst [vmem:[%s2287_s20 + $0x658] sm:$0xff] %v1434_v9  ;;  %v1437_v24 = vadd.f32 %v1181_v12, %v669_v11  ;;  %v1183_v25 = vmul.f32 0.5, %v927_v7  ;;  %v672_v26 = vmul.f32 0.5, %v416_v8  ;;  %v931_v27 = vld [vmem:[%s2257_s19 + $0x6a0] sm:$0xff]  ;;  %v420_v28 = vld [vmem:[%s2265_s29 + $0x6a8] sm:$0xff] }
 0x102   : > { %1691 = vst [vmem:[%s2287_s20 + $0x660] sm:$0xff] %v1435_v16  ;;  %v1438_v29 = vadd.f32 %v1182_v18, %v670_v17  ;;  %v1184_v30 = vmul.f32 0.5, %v928_v13  ;;  %v673_v31 = vmul.f32 0.5, %v417_v14  ;;  %v1185_v32 = vmul.f32 0.5, %v929_v15  ;;  %v932_v33 = vld [vmem:[%s2257_s19 + $0x6a8] sm:$0xff]  ;;  %v421_v34 = vld [vmem:[%s2265_s29 + $0x6b0] sm:$0xff] }
 0x103   : > { %v933_v35 = vld [vmem:[%s2257_s19 + $0x6b0] sm:$0xff]  ;;  %1692 = vst [vmem:[%s2287_s20 + $0x668] sm:$0xff] %v1436_v23  ;;  %1693 = vst [vmem:[%s2287_s20 + $0x670] sm:$0xff] %v1437_v24  ;;  %v1439_v36 = vadd.f32 %v1183_v25, %v671_v19  ;;  %v674_v37 = vmul.f32 0.5, %v418_v20  ;;  %v1186_v38 = vmul.f32 0.5, %v930_v21  ;;  %v675_v39 = vmul.f32 0.5, %v419_v22 }
 0x104   : > { %v422_v40 = vld [vmem:[%s2265_s29 + $0x6b8] sm:$0xff]  ;;  %v423_v42 = vld [vmem:[%s2265_s29 + $0x6c0] sm:$0xff]  ;;  %1694 = vst [vmem:[%s2287_s20 + $0x678] sm:$0xff] %v1438_v29  ;;  %v1440_v43 = vadd.f32 %v1184_v30, %v672_v26  ;;  %v1441_v44 = vadd.f32 %v1185_v32, %v673_v31  ;;  %v1187_v45 = vmul.f32 0.5, %v931_v27  ;;  %v676_v46 = vmul.f32 0.5, %v420_v28  ;;  %v424_v48 = vld [vmem:[%s2265_s29 + $0x6c8] sm:$0xff] }
 0x105   : > { %v934_v41 = vld [vmem:[%s2257_s19 + $0x6b8] sm:$0xff]  ;;  %v935_v47 = vld [vmem:[%s2257_s19 + $0x6c0] sm:$0xff]  ;;  %1695 = vst [vmem:[%s2287_s20 + $0x680] sm:$0xff] %v1439_v36  ;;  %v1442_v49 = vadd.f32 %v1186_v38, %v674_v37  ;;  %v1188_v50 = vmul.f32 0.5, %v932_v33  ;;  %v677_v51 = vmul.f32 0.5, %v421_v34  ;;  %v1189_v52 = vmul.f32 0.5, %v933_v35 }
 0x106   : > { %v936_v53 = vld [vmem:[%s2257_s19 + $0x6c8] sm:$0xff]  ;;  %v425_v54 = vld [vmem:[%s2265_s29 + $0x6d0] sm:$0xff]  ;;  %1696 = vst [vmem:[%s2287_s20 + $0x688] sm:$0xff] %v1440_v43  ;;  %1697 = vst [vmem:[%s2287_s20 + $0x690] sm:$0xff] %v1441_v44  ;;  %v1443_v56 = vadd.f32 %v1187_v45, %v675_v39  ;;  %v678_v57 = vmul.f32 0.5, %v422_v40  ;;  %v1190_v58 = vmul.f32 0.5, %v934_v41 }
 0x107   : > { %v937_v55 = vld [vmem:[%s2257_s19 + $0x6d0] sm:$0xff]  ;;  %v679_v59 = vmul.f32 0.5, %v423_v42  ;;  %v426_v60 = vld [vmem:[%s2265_s29 + $0x6d8] sm:$0xff]  ;;  %v427_v62 = vld [vmem:[%s2265_s29 + $0x6e0] sm:$0xff]  ;;  %1698 = vst [vmem:[%s2287_s20 + $0x698] sm:$0xff] %v1442_v49  ;;  %v1444_v63 = vadd.f32 %v1188_v50, %v676_v46  ;;  %v1445_v0 = vadd.f32 %v1189_v52, %v677_v51  ;;  %v1191_v1 = vmul.f32 0.5, %v935_v47 }
 0x108   : > { %v938_v61 = vld [vmem:[%s2257_s19 + $0x6d8] sm:$0xff]  ;;  %v680_v2 = vmul.f32 0.5, %v424_v48  ;;  %v939_v3 = vld [vmem:[%s2257_s19 + $0x6e0] sm:$0xff]  ;;  %v428_v4 = vld [vmem:[%s2265_s29 + $0x6e8] sm:$0xff]  ;;  %1699 = vst [vmem:[%s2287_s20 + $0x6a0] sm:$0xff] %v1443_v56  ;;  %v1446_v5 = vadd.f32 %v1190_v58, %v678_v57  ;;  %v1192_v6 = vmul.f32 0.5, %v936_v53 }
 0x109   : > { %v681_v7 = vmul.f32 0.5, %v425_v54  ;;  %v1193_v8 = vmul.f32 0.5, %v937_v55  ;;  %v940_v9 = vld [vmem:[%s2257_s19 + $0x6e8] sm:$0xff]  ;;  %v429_v10 = vld [vmem:[%s2265_s29 + $0x6f0] sm:$0xff]  ;;  %1700 = vst [vmem:[%s2287_s20 + $0x6a8] sm:$0xff] %v1444_v63  ;;  %1701 = vst [vmem:[%s2287_s20 + $0x6b0] sm:$0xff] %v1445_v0  ;;  %v1447_v12 = vadd.f32 %v1191_v1, %v679_v59 }
 0x10a   : > { %v941_v11 = vld [vmem:[%s2257_s19 + $0x6f0] sm:$0xff]  ;;  %v682_v13 = vmul.f32 0.5, %v426_v60  ;;  %v1194_v14 = vmul.f32 0.5, %v938_v61  ;;  %v683_v15 = vmul.f32 0.5, %v427_v62  ;;  %v430_v16 = vld [vmem:[%s2265_s29 + $0x6f8] sm:$0xff]  ;;  %v431_v18 = vld [vmem:[%s2265_s29 + $0x700] sm:$0xff]  ;;  %v1448_v19 = vadd.f32 %v1192_v6, %v680_v2 }
 0x10b   : > { %v942_v17 = vld [vmem:[%s2257_s19 + $0x6f8] sm:$0xff]  ;;  %1702 = vst [vmem:[%s2287_s20 + $0x6b8] sm:$0xff] %v1446_v5  ;;  %v1449_v20 = vadd.f32 %v1193_v8, %v681_v7  ;;  %v1195_v21 = vmul.f32 0.5, %v939_v3  ;;  %v684_v22 = vmul.f32 0.5, %v428_v4  ;;  %v943_v23 = vld [vmem:[%s2257_s19 + $0x700] sm:$0xff]  ;;  %v432_v24 = vld [vmem:[%s2265_s29 + $0x708] sm:$0xff] }
 0x10c   : > { %1703 = vst [vmem:[%s2287_s20 + $0x6c0] sm:$0xff] %v1447_v12  ;;  %v1450_v25 = vadd.f32 %v1194_v14, %v682_v13  ;;  %v1196_v26 = vmul.f32 0.5, %v940_v9  ;;  %v685_v27 = vmul.f32 0.5, %v429_v10  ;;  %v1197_v28 = vmul.f32 0.5, %v941_v11  ;;  %v944_v29 = vld [vmem:[%s2257_s19 + $0x708] sm:$0xff]  ;;  %v433_v30 = vld [vmem:[%s2265_s29 + $0x710] sm:$0xff] }
 0x10d   : > { %v945_v31 = vld [vmem:[%s2257_s19 + $0x710] sm:$0xff]  ;;  %1704 = vst [vmem:[%s2287_s20 + $0x6c8] sm:$0xff] %v1448_v19  ;;  %1705 = vst [vmem:[%s2287_s20 + $0x6d0] sm:$0xff] %v1449_v20  ;;  %v1451_v32 = vadd.f32 %v1195_v21, %v683_v15  ;;  %v686_v33 = vmul.f32 0.5, %v430_v16  ;;  %v1198_v34 = vmul.f32 0.5, %v942_v17  ;;  %v687_v35 = vmul.f32 0.5, %v431_v18 }
 0x10e   : > { %v434_v36 = vld [vmem:[%s2265_s29 + $0x718] sm:$0xff]  ;;  %v435_v38 = vld [vmem:[%s2265_s29 + $0x720] sm:$0xff]  ;;  %1706 = vst [vmem:[%s2287_s20 + $0x6d8] sm:$0xff] %v1450_v25  ;;  %v1452_v39 = vadd.f32 %v1196_v26, %v684_v22  ;;  %v1453_v40 = vadd.f32 %v1197_v28, %v685_v27  ;;  %v1199_v41 = vmul.f32 0.5, %v943_v23  ;;  %v688_v42 = vmul.f32 0.5, %v432_v24  ;;  %v436_v44 = vld [vmem:[%s2265_s29 + $0x728] sm:$0xff] }
 0x10f   : > { %v946_v37 = vld [vmem:[%s2257_s19 + $0x718] sm:$0xff]  ;;  %v947_v43 = vld [vmem:[%s2257_s19 + $0x720] sm:$0xff]  ;;  %1707 = vst [vmem:[%s2287_s20 + $0x6e0] sm:$0xff] %v1451_v32  ;;  %v1454_v45 = vadd.f32 %v1198_v34, %v686_v33  ;;  %v1200_v46 = vmul.f32 0.5, %v944_v29  ;;  %v689_v47 = vmul.f32 0.5, %v433_v30  ;;  %v1201_v48 = vmul.f32 0.5, %v945_v31 }
 0x110   : > { %v948_v49 = vld [vmem:[%s2257_s19 + $0x728] sm:$0xff]  ;;  %v437_v50 = vld [vmem:[%s2265_s29 + $0x730] sm:$0xff]  ;;  %1708 = vst [vmem:[%s2287_s20 + $0x6e8] sm:$0xff] %v1452_v39  ;;  %1709 = vst [vmem:[%s2287_s20 + $0x6f0] sm:$0xff] %v1453_v40  ;;  %v1455_v52 = vadd.f32 %v1199_v41, %v687_v35  ;;  %v690_v53 = vmul.f32 0.5, %v434_v36  ;;  %v1202_v54 = vmul.f32 0.5, %v946_v37 }
 0x111   : > { %v949_v51 = vld [vmem:[%s2257_s19 + $0x730] sm:$0xff]  ;;  %v691_v55 = vmul.f32 0.5, %v435_v38  ;;  %v438_v56 = vld [vmem:[%s2265_s29 + $0x738] sm:$0xff]  ;;  %v439_v58 = vld [vmem:[%s2265_s29 + $0x740] sm:$0xff]  ;;  %1710 = vst [vmem:[%s2287_s20 + $0x6f8] sm:$0xff] %v1454_v45  ;;  %v1456_v59 = vadd.f32 %v1200_v46, %v688_v42  ;;  %v1457_v60 = vadd.f32 %v1201_v48, %v689_v47  ;;  %v1203_v61 = vmul.f32 0.5, %v947_v43 }
 0x112   : > { %v950_v57 = vld [vmem:[%s2257_s19 + $0x738] sm:$0xff]  ;;  %v692_v62 = vmul.f32 0.5, %v436_v44  ;;  %v951_v63 = vld [vmem:[%s2257_s19 + $0x740] sm:$0xff]  ;;  %v440_v0 = vld [vmem:[%s2265_s29 + $0x748] sm:$0xff]  ;;  %1711 = vst [vmem:[%s2287_s20 + $0x700] sm:$0xff] %v1455_v52  ;;  %v1458_v1 = vadd.f32 %v1202_v54, %v690_v53  ;;  %v1204_v2 = vmul.f32 0.5, %v948_v49 }
 0x113   : > { %v693_v3 = vmul.f32 0.5, %v437_v50  ;;  %v1205_v4 = vmul.f32 0.5, %v949_v51  ;;  %v952_v5 = vld [vmem:[%s2257_s19 + $0x748] sm:$0xff]  ;;  %v441_v6 = vld [vmem:[%s2265_s29 + $0x750] sm:$0xff]  ;;  %1712 = vst [vmem:[%s2287_s20 + $0x708] sm:$0xff] %v1456_v59  ;;  %1713 = vst [vmem:[%s2287_s20 + $0x710] sm:$0xff] %v1457_v60  ;;  %v1459_v8 = vadd.f32 %v1203_v61, %v691_v55 }
 0x114   : > { %v953_v7 = vld [vmem:[%s2257_s19 + $0x750] sm:$0xff]  ;;  %v694_v9 = vmul.f32 0.5, %v438_v56  ;;  %v1206_v10 = vmul.f32 0.5, %v950_v57  ;;  %v695_v11 = vmul.f32 0.5, %v439_v58  ;;  %v442_v12 = vld [vmem:[%s2265_s29 + $0x758] sm:$0xff]  ;;  %v443_v14 = vld [vmem:[%s2265_s29 + $0x760] sm:$0xff]  ;;  %v1460_v15 = vadd.f32 %v1204_v2, %v692_v62 }
 0x115   : > { %v954_v13 = vld [vmem:[%s2257_s19 + $0x758] sm:$0xff]  ;;  %1714 = vst [vmem:[%s2287_s20 + $0x718] sm:$0xff] %v1458_v1  ;;  %v1461_v16 = vadd.f32 %v1205_v4, %v693_v3  ;;  %v1207_v17 = vmul.f32 0.5, %v951_v63  ;;  %v696_v18 = vmul.f32 0.5, %v440_v0  ;;  %v955_v19 = vld [vmem:[%s2257_s19 + $0x760] sm:$0xff]  ;;  %v444_v20 = vld [vmem:[%s2265_s29 + $0x768] sm:$0xff] }
 0x116   : > { %1715 = vst [vmem:[%s2287_s20 + $0x720] sm:$0xff] %v1459_v8  ;;  %v1462_v21 = vadd.f32 %v1206_v10, %v694_v9  ;;  %v1208_v22 = vmul.f32 0.5, %v952_v5  ;;  %v697_v23 = vmul.f32 0.5, %v441_v6  ;;  %v1209_v24 = vmul.f32 0.5, %v953_v7  ;;  %v956_v25 = vld [vmem:[%s2257_s19 + $0x768] sm:$0xff]  ;;  %v445_v26 = vld [vmem:[%s2265_s29 + $0x770] sm:$0xff] }
 0x117   : > { %v957_v27 = vld [vmem:[%s2257_s19 + $0x770] sm:$0xff]  ;;  %1716 = vst [vmem:[%s2287_s20 + $0x728] sm:$0xff] %v1460_v15  ;;  %1717 = vst [vmem:[%s2287_s20 + $0x730] sm:$0xff] %v1461_v16  ;;  %v1463_v28 = vadd.f32 %v1207_v17, %v695_v11  ;;  %v698_v29 = vmul.f32 0.5, %v442_v12  ;;  %v1210_v30 = vmul.f32 0.5, %v954_v13  ;;  %v699_v31 = vmul.f32 0.5, %v443_v14 }
 0x118   : > { %v446_v32 = vld [vmem:[%s2265_s29 + $0x778] sm:$0xff]  ;;  %v447_v34 = vld [vmem:[%s2265_s29 + $0x780] sm:$0xff]  ;;  %1718 = vst [vmem:[%s2287_s20 + $0x738] sm:$0xff] %v1462_v21  ;;  %v1464_v35 = vadd.f32 %v1208_v22, %v696_v18  ;;  %v1465_v36 = vadd.f32 %v1209_v24, %v697_v23  ;;  %v1211_v37 = vmul.f32 0.5, %v955_v19  ;;  %v700_v38 = vmul.f32 0.5, %v444_v20  ;;  %v448_v40 = vld [vmem:[%s2265_s29 + $0x788] sm:$0xff] }
 0x119   : > { %v958_v33 = vld [vmem:[%s2257_s19 + $0x778] sm:$0xff]  ;;  %v959_v39 = vld [vmem:[%s2257_s19 + $0x780] sm:$0xff]  ;;  %1719 = vst [vmem:[%s2287_s20 + $0x740] sm:$0xff] %v1463_v28  ;;  %v1466_v41 = vadd.f32 %v1210_v30, %v698_v29  ;;  %v1212_v42 = vmul.f32 0.5, %v956_v25  ;;  %v701_v43 = vmul.f32 0.5, %v445_v26  ;;  %v1213_v44 = vmul.f32 0.5, %v957_v27 }
 0x11a   : > { %v960_v45 = vld [vmem:[%s2257_s19 + $0x788] sm:$0xff]  ;;  %v449_v46 = vld [vmem:[%s2265_s29 + $0x790] sm:$0xff]  ;;  %1720 = vst [vmem:[%s2287_s20 + $0x748] sm:$0xff] %v1464_v35  ;;  %1721 = vst [vmem:[%s2287_s20 + $0x750] sm:$0xff] %v1465_v36  ;;  %v1467_v48 = vadd.f32 %v1211_v37, %v699_v31  ;;  %v702_v49 = vmul.f32 0.5, %v446_v32  ;;  %v1214_v50 = vmul.f32 0.5, %v958_v33 }
 0x11b   : > { %v961_v47 = vld [vmem:[%s2257_s19 + $0x790] sm:$0xff]  ;;  %v703_v51 = vmul.f32 0.5, %v447_v34  ;;  %v450_v52 = vld [vmem:[%s2265_s29 + $0x798] sm:$0xff]  ;;  %v451_v54 = vld [vmem:[%s2265_s29 + $0x7a0] sm:$0xff]  ;;  %1722 = vst [vmem:[%s2287_s20 + $0x758] sm:$0xff] %v1466_v41  ;;  %v1468_v55 = vadd.f32 %v1212_v42, %v700_v38  ;;  %v1469_v56 = vadd.f32 %v1213_v44, %v701_v43  ;;  %v1215_v57 = vmul.f32 0.5, %v959_v39 }
 0x11c   : > { %v962_v53 = vld [vmem:[%s2257_s19 + $0x798] sm:$0xff]  ;;  %v704_v58 = vmul.f32 0.5, %v448_v40  ;;  %v963_v59 = vld [vmem:[%s2257_s19 + $0x7a0] sm:$0xff]  ;;  %v452_v60 = vld [vmem:[%s2265_s29 + $0x7a8] sm:$0xff]  ;;  %1723 = vst [vmem:[%s2287_s20 + $0x760] sm:$0xff] %v1467_v48  ;;  %v1470_v61 = vadd.f32 %v1214_v50, %v702_v49  ;;  %v1216_v62 = vmul.f32 0.5, %v960_v45 }
 0x11d   : > { %v705_v63 = vmul.f32 0.5, %v449_v46  ;;  %v1217_v0 = vmul.f32 0.5, %v961_v47  ;;  %v964_v1 = vld [vmem:[%s2257_s19 + $0x7a8] sm:$0xff]  ;;  %v453_v2 = vld [vmem:[%s2265_s29 + $0x7b0] sm:$0xff]  ;;  %1724 = vst [vmem:[%s2287_s20 + $0x768] sm:$0xff] %v1468_v55  ;;  %1725 = vst [vmem:[%s2287_s20 + $0x770] sm:$0xff] %v1469_v56  ;;  %v1471_v4 = vadd.f32 %v1215_v57, %v703_v51 }
 0x11e   : > { %v965_v3 = vld [vmem:[%s2257_s19 + $0x7b0] sm:$0xff]  ;;  %v706_v5 = vmul.f32 0.5, %v450_v52  ;;  %v1218_v6 = vmul.f32 0.5, %v962_v53  ;;  %v707_v7 = vmul.f32 0.5, %v451_v54  ;;  %v454_v8 = vld [vmem:[%s2265_s29 + $0x7b8] sm:$0xff]  ;;  %v455_v10 = vld [vmem:[%s2265_s29 + $0x7c0] sm:$0xff]  ;;  %v1472_v11 = vadd.f32 %v1216_v62, %v704_v58 }
 0x11f   : > { %v966_v9 = vld [vmem:[%s2257_s19 + $0x7b8] sm:$0xff]  ;;  %1726 = vst [vmem:[%s2287_s20 + $0x778] sm:$0xff] %v1470_v61  ;;  %v1473_v12 = vadd.f32 %v1217_v0, %v705_v63  ;;  %v1219_v13 = vmul.f32 0.5, %v963_v59  ;;  %v708_v14 = vmul.f32 0.5, %v452_v60  ;;  %v967_v15 = vld [vmem:[%s2257_s19 + $0x7c0] sm:$0xff]  ;;  %v456_v16 = vld [vmem:[%s2265_s29 + $0x7c8] sm:$0xff] }
 0x120   : > { %1727 = vst [vmem:[%s2287_s20 + $0x780] sm:$0xff] %v1471_v4  ;;  %v1474_v17 = vadd.f32 %v1218_v6, %v706_v5  ;;  %v1220_v18 = vmul.f32 0.5, %v964_v1  ;;  %v709_v19 = vmul.f32 0.5, %v453_v2  ;;  %v1221_v20 = vmul.f32 0.5, %v965_v3  ;;  %v968_v21 = vld [vmem:[%s2257_s19 + $0x7c8] sm:$0xff]  ;;  %v457_v22 = vld [vmem:[%s2265_s29 + $0x7d0] sm:$0xff] }
 0x121   : > { %v969_v23 = vld [vmem:[%s2257_s19 + $0x7d0] sm:$0xff]  ;;  %1728 = vst [vmem:[%s2287_s20 + $0x788] sm:$0xff] %v1472_v11  ;;  %1729 = vst [vmem:[%s2287_s20 + $0x790] sm:$0xff] %v1473_v12  ;;  %v1475_v24 = vadd.f32 %v1219_v13, %v707_v7  ;;  %v710_v25 = vmul.f32 0.5, %v454_v8  ;;  %v1222_v26 = vmul.f32 0.5, %v966_v9  ;;  %v711_v27 = vmul.f32 0.5, %v455_v10 }
 0x122   : > { %v458_v28 = vld [vmem:[%s2265_s29 + $0x7d8] sm:$0xff]  ;;  %v459_v30 = vld [vmem:[%s2265_s29 + $0x7e0] sm:$0xff]  ;;  %1730 = vst [vmem:[%s2287_s20 + $0x798] sm:$0xff] %v1474_v17  ;;  %v1476_v31 = vadd.f32 %v1220_v18, %v708_v14  ;;  %v1477_v32 = vadd.f32 %v1221_v20, %v709_v19  ;;  %v1223_v33 = vmul.f32 0.5, %v967_v15  ;;  %v712_v34 = vmul.f32 0.5, %v456_v16  ;;  %v460_v36 = vld [vmem:[%s2265_s29 + $0x7e8] sm:$0xff] }
 0x123   : > { %v970_v29 = vld [vmem:[%s2257_s19 + $0x7d8] sm:$0xff]  ;;  %v971_v35 = vld [vmem:[%s2257_s19 + $0x7e0] sm:$0xff]  ;;  %1731 = vst [vmem:[%s2287_s20 + $0x7a0] sm:$0xff] %v1475_v24  ;;  %v1478_v37 = vadd.f32 %v1222_v26, %v710_v25  ;;  %v1224_v38 = vmul.f32 0.5, %v968_v21  ;;  %v713_v39 = vmul.f32 0.5, %v457_v22  ;;  %v1225_v40 = vmul.f32 0.5, %v969_v23 }
 0x124   : > { %v972_v41 = vld [vmem:[%s2257_s19 + $0x7e8] sm:$0xff]  ;;  %v461_v42 = vld [vmem:[%s2265_s29 + $0x7f0] sm:$0xff]  ;;  %1732 = vst [vmem:[%s2287_s20 + $0x7a8] sm:$0xff] %v1476_v31  ;;  %1733 = vst [vmem:[%s2287_s20 + $0x7b0] sm:$0xff] %v1477_v32  ;;  %v1479_v44 = vadd.f32 %v1223_v33, %v711_v27  ;;  %v714_v45 = vmul.f32 0.5, %v458_v28  ;;  %v1226_v46 = vmul.f32 0.5, %v970_v29 }
 0x125   : > { %v973_v43 = vld [vmem:[%s2257_s19 + $0x7f0] sm:$0xff]  ;;  %v715_v47 = vmul.f32 0.5, %v459_v30  ;;  %v462_v48 = vld [vmem:[%s2265_s29 + $0x7f8] sm:$0xff]  ;;  %1734 = vst [vmem:[%s2287_s20 + $0x7b8] sm:$0xff] %v1478_v37  ;;  %v1480_v50 = vadd.f32 %v1224_v38, %v712_v34  ;;  %v1481_v51 = vadd.f32 %v1225_v40, %v713_v39  ;;  %v1227_v52 = vmul.f32 0.5, %v971_v35  ;;  %p3105_p1 = scmp.ne.s32.totalorder %s3100_s21, 0 }
 0x126   : > { %v974_v49 = vld [vmem:[%s2257_s19 + $0x7f8] sm:$0xff]  ;;  %v716_v53 = vmul.f32 0.5, %v460_v36  ;;  %1735 = vst [vmem:[%s2287_s20 + $0x7c0] sm:$0xff] %v1479_v44  ;;  %v1482_v54 = vadd.f32 %v1226_v46, %v714_v45  ;;  %v1228_v55 = vmul.f32 0.5, %v972_v41  ;;  %v717_v56 = vmul.f32 0.5, %v461_v42  ;;  %s2072_s26 = smov [#allocation7]  }
 0x127   : > { %v1229_v57 = vmul.f32 0.5, %v973_v43  ;;  %1736 = vst [vmem:[%s2287_s20 + $0x7c8] sm:$0xff] %v1480_v50  ;;  %1737 = vst [vmem:[%s2287_s20 + $0x7d0] sm:$0xff] %v1481_v51  ;;  %v1483_v58 = vadd.f32 %v1227_v52, %v715_v47  ;;  %v718_v59 = vmul.f32 0.5, %v462_v48  ;;  %v1230_v60 = vmul.f32 0.5, %v974_v49  ;;  %p1998_p12 = pnand %p1997_p13, %p3105_p1  ;;  %s2000_s27 = sshll.u32 %s2072_s26, 4  ;;  %s2001_s27 = int_to_ptr.vmem [resolvable:$false] %s2000_s27 }
 0x128   : > { %1738 = vst [vmem:[%s2287_s20 + $0x7d8] sm:$0xff] %v1482_v54  ;;  %v1484_v61 = vadd.f32 %v1228_v55, %v716_v53  ;;  %s2002_s25 = scalar_lea.vmem %s2001_s27, 65536  ;;  %p2003_p5 = scmp.lt.s32.totalorder %s3045_s6, %s2001_s27 }
 0x129   : > { %v1485_v62 = vadd.f32 %v1229_v57, %v717_v56  ;;  %1739 = vst [vmem:[%s2287_s20 + $0x7e0] sm:$0xff] %v1483_v58  ;;  %v1486_v63 = vadd.f32 %v1230_v60, %v718_v59  ;;  %p1999_p10 = pneg %p1998_p12  ;;  %p2004_p7 = scmp.lt.s32.totalorder %s2002_s25, %s1996_s24 }
 0x12a   : > { %1740 = vst [vmem:[%s2287_s20 + $0x7e8] sm:$0xff] %v1484_v61 }
 0x12b   : > { %1741 = vst [vmem:[%s2287_s20 + $0x7f0] sm:$0xff] %v1485_v62  ;;  %1742 = vst [vmem:[%s2287_s20 + $0x7f8] sm:$0xff] %v1486_v63  ;;  %p2005_p9 = por %p2004_p7, %p2003_p5 }
 0x12d   : > { %p2006_p11 = pnand %p2005_p9, %p1999_p10 }
 0x12f   : > { %2009 = shalt.err (!%p2006_p11)
}
 0x130   : > { %s2010_s7 = scalar_lea.hbm %s3042_s17, 32768  ;;  %s2014_s4 = scalar_lea.hbm %s3095_s2, 65536 }
 0x131   : > { %p2011_p3 = scmp.ne.s32.totalorder %s3042_s17, %s2010_s7  ;;  %p2015_p2 = scmp.lt.u32.totalorder %s3042_s17, %s3095_s2 }
 0x132   : > { %p2016_p4 = scmp.lt.u32.totalorder %s2014_s4, %s2010_s7  ;;  %p2018_p13 = scmp.lt.u32.totalorder %s2010_s7, %s3042_s17 }
 0x133   : > { %p2012_p8 = pnand %p2011_p3, %p3105_p1 }
 0x134   : > { %p2017_p6 = por %p2016_p4, %p2015_p2 }
 0x135   : > { %p2013_p0 = pneg %p2012_p8 }
 0x136   : > { %p2019_p12 = por %p2018_p13, %p2017_p6 }
 0x138   : > { %p2020_p10 = pnand %p2019_p12, %p2013_p0 }
 0x13a   : > { %2023 = shalt.err (!%p2020_p10)
}
 0x13b   : > { %s2073_s23 = smov 2048   ;;  %s2074_s29 = smov 128  }
 0x13c   : > { %1885 = dma.vmem_to_hbm [thread:$0]  (%p3105_p1), %s3045_s6, 32768, %s3042_s17, %s1744_s28, %s2073_s23, %s2073_s23, %s2074_s29  }
 0x13d PF: > { %s1773_s20 = sand.u32 1, %s2054_s9   ;;  %p3106_p5 = scmp.ne.s32.totalorder %s3101_s22, 0 }
 0x13e   : > { %p3107_p7 = scmp.ge.s32.totalorder %s2066_s12, 2  ;;  %s1774_s5 = scalar_lea.sflag [#allocation4], %s1773_s20 }
 0x140   : > { %p1895_p9 = pnand %p3107_p7, %p3106_p5 }
 0x142   : > { %2049 = dma.done.wait (!%p1895_p9), %s1774_s5, 32768  }
 0x143   : > { %2051 = vsyncadd (!%p1895_p9), %s1774_s5, 4294934528  ;;  %p18_p11 = scmp.ge.s32.totalorder %s2115_s15, 4   ;;  %s3108_s9 = smov %s2058_s10 }
 0x144   : > { %s3109_s10 = smov %s2062_s11  ;;  %s3110_s11 = smov %s2127_s18 }
 0x145   : > { %s3111_s12 = smov %s2115_s15  ;;  %20 = sbr.rel (!%p18_p11) target bundleno = 7 (0x7), region = 86 }
 0x14c   :  { %1779 = vsyncpa [#allocation3], 1 }
 0x14d   :  { %1781 = vsyncpa [#allocation3 + $0x1], 1 }
 0x14e   :  { %1782 = vsyncpa [#allocation6], 1 }
 0x14f   :  { %1784 = vsyncpa [#allocation6 + $0x1], 1 }
 0x150   :  { %1785 = vsyncpa [#allocation4], 1 }
 0x151   :  { %1787 = vsyncpa [#allocation4 + $0x1], 1 }

</bundles_post_ra>
